<compile_context>
chip_gen: v6e
topology: v6e:2x2x1
jax: 0.10.0
libtpu: 0.0.40
codegen_flags: <defaults>
</compile_context>

<pallas_src>
import jax
import jax.numpy as jnp
from jax.experimental import pallas as pl
from jax.experimental.pallas import tpu as pltpu


# --------------------------------------------------------------------------
# Kernel A: conv1 + bias + ReLU + BN + maxpool + conv2 + bias (one image/step)
# --------------------------------------------------------------------------
def _fused_conv_kernel(xcol_ref, w1_ref, b1_ref, s1_ref, t1_ref,
                       w2_ref, b2_ref, o_ref, pad_ref, col_ref):
    """
    xcol_ref: (1, H*W, 9*Cin)   conv1 im2col patches of one image (y-major)
    w1_ref:   (9*Cin, C1)       conv1 weight, tap-major / cin-minor rows
    b1_ref:   (1, C1)           conv1 bias
    s1_ref:   (1, C1)           folded BN scale  (gamma / sqrt(var+eps))
    t1_ref:   (1, C1)           folded BN shift  (beta - mean*scale)
    w2_ref:   (9*C1, C2)        conv2 weight, tap-major / c1-minor rows
    b2_ref:   (1, C2)           conv2 bias
    o_ref:    (1, Ho*Wo, C2)    conv2 output of one image (NHWC, y-major)
    pad_ref:  (Ho+2, Wo+2, C1)  VMEM scratch: zero-padded pooled map
    col_ref:  (Ho*Wo, 9*C1)     VMEM scratch: conv2 im2col matrix
    """
    C1 = w1_ref.shape[1]
    Ho = pad_ref.shape[0] - 2
    Wo = pad_ref.shape[1] - 2

    # conv1 as a single K=9*Cin matmul, then bias + ReLU + BN (eval, folded).
    y1 = jnp.dot(xcol_ref[0], w1_ref[...], preferred_element_type=jnp.float32)
    y1 = jnp.maximum(y1 + b1_ref[...], 0.0)
    y1 = y1 * s1_ref[...] + t1_ref[...]                       # (H*W, C1)

    # 2x2 / stride-2 max pool.
    a = y1.reshape(Ho, 2, Wo, 2, C1)
    pooled = jnp.maximum(
        jnp.maximum(a[:, 0, :, 0, :], a[:, 0, :, 1, :]),
        jnp.maximum(a[:, 1, :, 0, :], a[:, 1, :, 1, :]))      # (Ho, Wo, C1)

    # In-kernel zero padding for conv2.  Zero the scratch every step (cheap,
    # ~10% of the per-step store traffic) so the kernel stays correct when the
    # "parallel" batch axis is sharded across TensorCores (per-core scratch
    # would otherwise never be initialised for cores with program_id > 0).
    pad_ref[...] = jnp.zeros_like(pad_ref)
    pad_ref[pl.ds(1, Ho), pl.ds(1, Wo), :] = pooled

    # Build the conv2 im2col matrix (Ho*Wo, 9*C1) with 9 lane-slice stores,
    # then contract with a single K=9*C1 matmul.
    for dy in range(3):
        for dx in range(3):
            t = dy * 3 + dx
            tap = pad_ref[pl.ds(dy, Ho), pl.ds(dx, Wo), :].reshape(Ho * Wo, C1)
            col_ref[:, pl.ds(t * C1, C1)] = tap

    y2 = jnp.dot(col_ref[...], w2_ref[...],
                 preferred_element_type=jnp.float32) + b2_ref[...]
    o_ref[0] = y2.astype(o_ref.dtype)


# --------------------------------------------------------------------------
# Kernel B: fully-connected layer, tiled over the reduction (F) axis.
# --------------------------------------------------------------------------
def _fc_kernel(x_ref, w_ref, b_ref, o_ref, acc_ref):
    """x:(N,TK)  w:(TK,ncp)  b:(1,ncp)  o:(N,ncp)  acc:(N,ncp) f32 scratch."""
    k = pl.program_id(0)

    @pl.when(k == 0)
    def _():
        acc_ref[...] = jnp.zeros_like(acc_ref)

    acc_ref[...] += jnp.dot(x_ref[...], w_ref[...],
                            preferred_element_type=jnp.float32)

    @pl.when(k == pl.num_programs(0) - 1)
    def _():
        o_ref[...] = (acc_ref[...] + b_ref[...]).astype(o_ref.dtype)


# --------------------------------------------------------------------------
# Wrapper
# --------------------------------------------------------------------------
def net_forward(x_nchw, kp, nc):
    N, Cin, H, W = x_nchw.shape
    assert H % 2 == 0 and W % 2 == 0
    C1 = kp["w1col"].shape[1]
    C2 = kp["w2col"].shape[1]
    ncp = kp["wfc"].shape[1]
    Ho, Wo = H // 2, W // 2
    HW = H * W
    K1 = kp["w1col"].shape[0]          # 9 * Cin
    F = Ho * Wo * C2

    # NHWC + wrapper-side im2col for conv1 (keeps Cin=3 off the lane axis and
    # gives the kernel a K=27 contraction in one dot).  Tap order = dy*3+dx,
    # channel-minor, matching w1col rows.
    x = jnp.transpose(x_nchw, (0, 2, 3, 1)).astype(jnp.float32)
    xp = jnp.pad(x, ((0, 0), (1, 1), (1, 1), (0, 0)))
    xcol = jnp.concatenate(
        [xp[:, dy:dy + H, dx:dx + W, :] for dy in range(3) for dx in range(3)],
        axis=-1).reshape(N, HW, K1)

    # ---- fused conv1 + ReLU + BN + pool + conv2 ---------------------------
    out2 = pl.pallas_call(
        _fused_conv_kernel,
        out_shape=jax.ShapeDtypeStruct((N, Ho * Wo, C2), jnp.float32),
        grid=(N,),
        in_specs=[
            pl.BlockSpec((1, HW, K1), lambda n: (n, 0, 0)),
            pl.BlockSpec((K1, C1), lambda n: (0, 0)),
            pl.BlockSpec((1, C1), lambda n: (0, 0)),
            pl.BlockSpec((1, C1), lambda n: (0, 0)),
            pl.BlockSpec((1, C1), lambda n: (0, 0)),
            pl.BlockSpec((9 * C1, C2), lambda n: (0, 0)),
            pl.BlockSpec((1, C2), lambda n: (0, 0)),
        ],
        out_specs=pl.BlockSpec((1, Ho * Wo, C2), lambda n: (n, 0, 0)),
        scratch_shapes=[
            pltpu.VMEM((Ho + 2, Wo + 2, C1), jnp.float32),
            pltpu.VMEM((Ho * Wo, 9 * C1), jnp.float32),
        ],
        compiler_params=pltpu.CompilerParams(
            dimension_semantics=("parallel",)),
    )(xcol, kp["w1col"], kp["b1"], kp["bn_scale"], kp["bn_shift"],
      kp["w2col"], kp["b2"])

    # Free, contiguous NHWC flatten (w_fc rows were pre-permuted to match).
    feat = out2.reshape(N, F)

    # ---- fully connected, tiled over F with an accumulator ----------------
    TK = F
    for cand in (8192, 4096, 2048, 1024, 512, 256, 128):
        if F % cand == 0:
            TK = cand
            break
    assert F % TK == 0

    out = pl.pallas_call(
        _fc_kernel,
        out_shape=jax.ShapeDtypeStruct((N, ncp), jnp.float32),
        grid=(F // TK,),
        in_specs=[
            pl.BlockSpec((N, TK), lambda k: (0, k)),
            pl.BlockSpec((TK, ncp), lambda k: (k, 0)),
            pl.BlockSpec((1, ncp), lambda k: (0, 0)),
        ],
        out_specs=pl.BlockSpec((N, ncp), lambda k: (0, 0)),
        scratch_shapes=[pltpu.VMEM((N, ncp), jnp.float32)],
        compiler_params=pltpu.CompilerParams(
            dimension_semantics=("arbitrary",)),
    )(feat, kp["wfc"], kp["bfc"])

    return out[:, :nc]


# --------------------------------------------------------------------------
# Parameters: torch-layout creation + one-time host-side repack for kernels
# --------------------------------------------------------------------------
def make_torch_params(key, Cin, H, W, nc):
    """Parameters in the layouts nn.Module would hold (OIHW convs, (nc,F) fc)."""
    C1, C2 = 64, 128
    Ho, Wo = H // 2, W // 2
    F = C2 * Ho * Wo
    ks = jax.random.split(key, 10)
    return dict(
        w1=0.05 * jax.random.normal(ks[0], (C1, Cin, 3, 3), jnp.float32),
        b1=0.05 * jax.random.normal(ks[1], (C1,), jnp.float32),
        gamma=1.0 + 0.1 * jax.random.normal(ks[2], (C1,), jnp.float32),
        beta=0.1 * jax.random.normal(ks[3], (C1,), jnp.float32),
        run_mean=0.1 * jax.random.normal(ks[4], (C1,), jnp.float32),
        run_var=1.0 + 0.1 * jnp.abs(jax.random.normal(ks[5], (C1,), jnp.float32)),
        eps=1e-5,
        w2=0.05 * jax.random.normal(ks[6], (C2, C1, 3, 3), jnp.float32),
        b2=0.05 * jax.random.normal(ks[7], (C2,), jnp.float32),
        w_fc=0.02 * jax.random.normal(ks[8], (nc, F), jnp.float32),
        b_fc=0.02 * jax.random.normal(ks[9], (nc,), jnp.float32),
    )


def prepare_kernel_params(tp, Cin, H, W, nc):
    """One-time repack: im2col weights, folded BN, NHWC-permuted + lane-padded FC."""
    C1, C2 = tp["w1"].shape[0], tp["w2"].shape[0]
    Ho, Wo = H // 2, W // 2
    ncp = ((nc + 127) // 128) * 128

    # OIHW -> (kh*kw*Cin, Cout), tap-major / cin-minor rows.
    w1col = jnp.transpose(tp["w1"], (2, 3, 1, 0)).reshape(9 * Cin, C1)
    w2col = jnp.transpose(tp["w2"], (2, 3, 1, 0)).reshape(9 * C1, C2)

    # Eval-mode BatchNorm folded to scale/shift.
    scale = tp["gamma"] / jnp.sqrt(tp["run_var"] + tp["eps"])
    shift = tp["beta"] - tp["run_mean"] * scale

    # FC rows: torch order is NCHW-flatten (c, y, x); permute once to the
    # NHWC-flatten order (y, x, c) produced by the fused conv kernel, and pad
    # the output dim to a lane-dense multiple of 128.
    w_fc = tp["w_fc"].T                                       # (F, nc), NCHW rows
    w_fc = (w_fc.reshape(C2, Ho, Wo, nc)
                 .transpose(1, 2, 0, 3)
                 .reshape(Ho * Wo * C2, nc))
    wfc = jnp.zeros((Ho * Wo * C2, ncp), jnp.float32).at[:, :nc].set(w_fc)
    bfc = jnp.zeros((1, ncp), jnp.float32).at[0, :nc].set(tp["b_fc"])

    return dict(
        w1col=w1col, b1=tp["b1"].reshape(1, C1),
        bn_scale=scale.reshape(1, C1), bn_shift=shift.reshape(1, C1),
        w2col=w2col, b2=tp["b2"].reshape(1, C2),
        wfc=wfc, bfc=bfc)


# --------------------------------------------------------------------------
# Pure-JAX reference (torch-faithful forward, eval-mode BN)
# --------------------------------------------------------------------------
def reference_forward(x_nchw, tp):
    prec = jax.lax.Precision.HIGHEST
    y = jax.lax.conv_general_dilated(
        x_nchw.astype(jnp.float32), tp["w1"], (1, 1), ((1, 1), (1, 1)),
        dimension_numbers=("NCHW", "OIHW", "NCHW"), precision=prec)
    y = y + tp["b1"][None, :, None, None]
    y = jnp.maximum(y, 0.0)
    scale = tp["gamma"] / jnp.sqrt(tp["run_var"] + tp["eps"])
    shift = tp["beta"] - tp["run_mean"] * scale
    y = y * scale[None, :, None, None] + shift[None, :, None, None]
    y = jax.lax.reduce_window(y, -jnp.inf, jax.lax.max,
                              (1, 1, 2, 2), (1, 1, 2, 2), "VALID")
    y = jax.lax.conv_general_dilated(
        y, tp["w2"], (1, 1), ((1, 1), (1, 1)),
        dimension_numbers=("NCHW", "OIHW", "NCHW"), precision=prec)
    y = y + tp["b2"][None, :, None, None]
    feat = y.reshape(y.shape[0], -1)                          # NCHW flatten
    return jnp.dot(feat, tp["w_fc"].T, precision=prec) + tp["b_fc"]


# --------------------------------------------------------------------------
# Driver
# --------------------------------------------------------------------------
if __name__ == "__main__":
    # Small shapes consistent with the forward pass (fc in_features follows
    # (H/2)*(W/2)*128 as implied by the forward, not the hard-coded 112*112).
    N, Cin, H, W, nc = 2, 3, 16, 16, 10
    key = jax.random.PRNGKey(0)
    kx, kparam = jax.random.split(key)
    x = jax.random.normal(kx, (N, Cin, H, W), jnp.float32)

    torch_params = make_torch_params(kparam, Cin, H, W, nc)
    kernel_params = prepare_kernel_params(torch_params, Cin, H, W, nc)

    out = jax.block_until_ready(net_forward(x, kernel_params, nc))
    ref = jax.block_until_ready(reference_forward(x, torch_params))

    assert out.shape == (N, nc)
    max_err = float(jnp.max(jnp.abs(out - ref)))
    assert jnp.allclose(out, ref, rtol=1e-4, atol=1e-4), f"max abs err {max_err}"
    print("KERNEL_OK")
</pallas_src>

<mosaic_0001>
module attributes {stable_mosaic.version = 11 : i64} {
  func.func @_fused_conv_kernel(%arg0: i32, %arg1: memref<1x256x27xf32, #tpu.memory_space<vmem>>, %arg2: memref<27x64xf32, #tpu.memory_space<vmem>>, %arg3: memref<1x64xf32, #tpu.memory_space<vmem>>, %arg4: memref<1x64xf32, #tpu.memory_space<vmem>>, %arg5: memref<1x64xf32, #tpu.memory_space<vmem>>, %arg6: memref<576x128xf32, #tpu.memory_space<vmem>>, %arg7: memref<1x128xf32, #tpu.memory_space<vmem>>, %arg8: memref<1x64x128xf32, #tpu.memory_space<vmem>>, %arg9: memref<10x10x64xf32, #tpu.memory_space<vmem>>, %arg10: memref<64x576xf32, #tpu.memory_space<vmem>>) attributes {dimension_semantics = [#tpu.dimension_semantics<parallel>], iteration_bounds = array<i64: 2>, scalar_prefetch = 0 : i64, scratch_operands = 2 : i64, tpu.core_type = #tpu.core_type<tc>, window_params = [{transform_indices = @transform_0, window_bounds = array<i64: 1, 256, 27>}, {pipeline_mode = #tpu.pipeline_mode<synchronous>, transform_indices = @transform_1, window_bounds = array<i64: 27, 64>}, {pipeline_mode = #tpu.pipeline_mode<synchronous>, transform_indices = @transform_2, window_bounds = array<i64: 1, 64>}, {pipeline_mode = #tpu.pipeline_mode<synchronous>, transform_indices = @transform_3, window_bounds = array<i64: 1, 64>}, {pipeline_mode = #tpu.pipeline_mode<synchronous>, transform_indices = @transform_4, window_bounds = array<i64: 1, 64>}, {pipeline_mode = #tpu.pipeline_mode<synchronous>, transform_indices = @transform_5, window_bounds = array<i64: 576, 128>}, {pipeline_mode = #tpu.pipeline_mode<synchronous>, transform_indices = @transform_6, window_bounds = array<i64: 1, 128>}, {transform_indices = @transform_7, window_bounds = array<i64: 1, 64, 128>}]} {
    %c0 = arith.constant 0 : index
    %c0_0 = arith.constant 0 : index
    %c0_1 = arith.constant 0 : index
    %0 = vector.load %arg1[%c0, %c0_0, %c0_1] : memref<1x256x27xf32, #tpu.memory_space<vmem>>, vector<1x256x27xf32>
    %1 = vector.shape_cast %0 : vector<1x256x27xf32> to vector<256x27xf32>
    %c0_2 = arith.constant 0 : index
    %c0_3 = arith.constant 0 : index
    %2 = vector.load %arg2[%c0_2, %c0_3] : memref<27x64xf32, #tpu.memory_space<vmem>>, vector<27x64xf32>
    %cst = arith.constant dense<0.000000e+00> : vector<256x64xf32>
    %3 = tpu.matmul %1, %2, %cst {dimension_numbers = #tpu.dot_dimension_numbers<[1], [0], [0], [1], [0, 0, 1, 1], [], []>} : vector<256x27xf32>, vector<27x64xf32>, vector<256x64xf32> -> vector<256x64xf32>
    %c0_4 = arith.constant 0 : index
    %c0_5 = arith.constant 0 : index
    %4 = vector.load %arg3[%c0_4, %c0_5] : memref<1x64xf32, #tpu.memory_space<vmem>>, vector<1x64xf32>
    %5 = vector.broadcast %4 : vector<1x64xf32> to vector<256x64xf32>
    %6 = arith.addf %3, %5 : vector<256x64xf32>
    %cst_6 = arith.constant 0.000000e+00 : f32
    %7 = vector.broadcast %cst_6 : f32 to vector<256x64xf32>
    %8 = arith.maximumf %6, %7 : vector<256x64xf32>
    %c0_7 = arith.constant 0 : index
    %c0_8 = arith.constant 0 : index
    %9 = vector.load %arg4[%c0_7, %c0_8] : memref<1x64xf32, #tpu.memory_space<vmem>>, vector<1x64xf32>
    %10 = vector.broadcast %9 : vector<1x64xf32> to vector<256x64xf32>
    %11 = arith.mulf %8, %10 : vector<256x64xf32>
    %c0_9 = arith.constant 0 : index
    %c0_10 = arith.constant 0 : index
    %12 = vector.load %arg5[%c0_9, %c0_10] : memref<1x64xf32, #tpu.memory_space<vmem>>, vector<1x64xf32>
    %13 = vector.broadcast %12 : vector<1x64xf32> to vector<256x64xf32>
    %14 = arith.addf %11, %13 : vector<256x64xf32>
    %15 = vector.shape_cast %14 : vector<256x64xf32> to vector<8x2x8x2x64xf32>
    %16 = vector.extract_strided_slice %15 {offsets = [0, 0, 0, 0, 0], sizes = [8, 1, 8, 1, 64], strides = [1, 1, 1, 1, 1]} : vector<8x2x8x2x64xf32> to vector<8x1x8x1x64xf32>
    %17 = vector.shape_cast %16 : vector<8x1x8x1x64xf32> to vector<8x8x64xf32>
    %18 = vector.extract_strided_slice %15 {offsets = [0, 0, 0, 1, 0], sizes = [8, 1, 8, 1, 64], strides = [1, 1, 1, 1, 1]} : vector<8x2x8x2x64xf32> to vector<8x1x8x1x64xf32>
    %19 = vector.shape_cast %18 : vector<8x1x8x1x64xf32> to vector<8x8x64xf32>
    %20 = arith.maximumf %17, %19 : vector<8x8x64xf32>
    %21 = vector.extract_strided_slice %15 {offsets = [0, 1, 0, 0, 0], sizes = [8, 1, 8, 1, 64], strides = [1, 1, 1, 1, 1]} : vector<8x2x8x2x64xf32> to vector<8x1x8x1x64xf32>
    %22 = vector.shape_cast %21 : vector<8x1x8x1x64xf32> to vector<8x8x64xf32>
    %23 = vector.extract_strided_slice %15 {offsets = [0, 1, 0, 1, 0], sizes = [8, 1, 8, 1, 64], strides = [1, 1, 1, 1, 1]} : vector<8x2x8x2x64xf32> to vector<8x1x8x1x64xf32>
    %24 = vector.shape_cast %23 : vector<8x1x8x1x64xf32> to vector<8x8x64xf32>
    %25 = arith.maximumf %22, %24 : vector<8x8x64xf32>
    %26 = arith.maximumf %20, %25 : vector<8x8x64xf32>
    %cst_11 = arith.constant 0.000000e+00 : f32
    %27 = vector.broadcast %cst_11 : f32 to vector<10x10x64xf32>
    %c0_12 = arith.constant 0 : index
    %c0_13 = arith.constant 0 : index
    %c0_14 = arith.constant 0 : index
    %28 = vector.load %arg9[%c0_12, %c0_13, %c0_14] : memref<10x10x64xf32, #tpu.memory_space<vmem>>, vector<10x10x64xf32>
    tpu.vector_store %arg9[%c0_12, %c0_13, %c0_14], %27 {strides = array<i32>} : memref<10x10x64xf32, #tpu.memory_space<vmem>>, vector<10x10x64xf32>,
    %c1 = arith.constant 1 : index
    %c1_15 = arith.constant 1 : index
    %c0_16 = arith.constant 0 : index
    %29 = vector.load %arg9[%c1, %c1_15, %c0_16] : memref<10x10x64xf32, #tpu.memory_space<vmem>>, vector<8x8x64xf32>
    tpu.vector_store %arg9[%c1, %c1_15, %c0_16], %26 {strides = array<i32>} : memref<10x10x64xf32, #tpu.memory_space<vmem>>, vector<8x8x64xf32>,
    %c0_17 = arith.constant 0 : index
    %c0_18 = arith.constant 0 : index
    %c0_19 = arith.constant 0 : index
    %30 = vector.load %arg9[%c0_17, %c0_18, %c0_19] : memref<10x10x64xf32, #tpu.memory_space<vmem>>, vector<8x8x64xf32>
    %31 = vector.shape_cast %30 : vector<8x8x64xf32> to vector<64x64xf32>
    %c0_20 = arith.constant 0 : index
    %c0_21 = arith.constant 0 : index
    %32 = vector.load %arg10[%c0_20, %c0_21] : memref<64x576xf32, #tpu.memory_space<vmem>>, vector<64x64xf32>
    tpu.vector_store %arg10[%c0_20, %c0_21], %31 {strides = array<i32>} : memref<64x576xf32, #tpu.memory_space<vmem>>, vector<64x64xf32>,
    %c0_22 = arith.constant 0 : index
    %c1_23 = arith.constant 1 : index
    %c0_24 = arith.constant 0 : index
    %33 = vector.load %arg9[%c0_22, %c1_23, %c0_24] : memref<10x10x64xf32, #tpu.memory_space<vmem>>, vector<8x8x64xf32>
    %34 = vector.shape_cast %33 : vector<8x8x64xf32> to vector<64x64xf32>
    %c0_25 = arith.constant 0 : index
    %c64 = arith.constant 64 : index
    %35 = vector.load %arg10[%c0_25, %c64] : memref<64x576xf32, #tpu.memory_space<vmem>>, vector<64x64xf32>
    tpu.vector_store %arg10[%c0_25, %c64], %34 {strides = array<i32>} : memref<64x576xf32, #tpu.memory_space<vmem>>, vector<64x64xf32>,
    %c0_26 = arith.constant 0 : index
    %c2 = arith.constant 2 : index
    %c0_27 = arith.constant 0 : index
    %36 = vector.load %arg9[%c0_26, %c2, %c0_27] : memref<10x10x64xf32, #tpu.memory_space<vmem>>, vector<8x8x64xf32>
    %37 = vector.shape_cast %36 : vector<8x8x64xf32> to vector<64x64xf32>
    %c0_28 = arith.constant 0 : index
    %c128 = arith.constant 128 : index
    %38 = vector.load %arg10[%c0_28, %c128] : memref<64x576xf32, #tpu.memory_space<vmem>>, vector<64x64xf32>
    tpu.vector_store %arg10[%c0_28, %c128], %37 {strides = array<i32>} : memref<64x576xf32, #tpu.memory_space<vmem>>, vector<64x64xf32>,
    %c1_29 = arith.constant 1 : index
    %c0_30 = arith.constant 0 : index
    %c0_31 = arith.constant 0 : index
    %39 = vector.load %arg9[%c1_29, %c0_30, %c0_31] : memref<10x10x64xf32, #tpu.memory_space<vmem>>, vector<8x8x64xf32>
    %40 = vector.shape_cast %39 : vector<8x8x64xf32> to vector<64x64xf32>
    %c0_32 = arith.constant 0 : index
    %c192 = arith.constant 192 : index
    %41 = vector.load %arg10[%c0_32, %c192] : memref<64x576xf32, #tpu.memory_space<vmem>>, vector<64x64xf32>
    tpu.vector_store %arg10[%c0_32, %c192], %40 {strides = array<i32>} : memref<64x576xf32, #tpu.memory_space<vmem>>, vector<64x64xf32>,
    %c1_33 = arith.constant 1 : index
    %c1_34 = arith.constant 1 : index
    %c0_35 = arith.constant 0 : index
    %42 = vector.load %arg9[%c1_33, %c1_34, %c0_35] : memref<10x10x64xf32, #tpu.memory_space<vmem>>, vector<8x8x64xf32>
    %43 = vector.shape_cast %42 : vector<8x8x64xf32> to vector<64x64xf32>
    %c0_36 = arith.constant 0 : index
    %c256 = arith.constant 256 : index
    %44 = vector.load %arg10[%c0_36, %c256] : memref<64x576xf32, #tpu.memory_space<vmem>>, vector<64x64xf32>
    tpu.vector_store %arg10[%c0_36, %c256], %43 {strides = array<i32>} : memref<64x576xf32, #tpu.memory_space<vmem>>, vector<64x64xf32>,
    %c1_37 = arith.constant 1 : index
    %c2_38 = arith.constant 2 : index
    %c0_39 = arith.constant 0 : index
    %45 = vector.load %arg9[%c1_37, %c2_38, %c0_39] : memref<10x10x64xf32, #tpu.memory_space<vmem>>, vector<8x8x64xf32>
    %46 = vector.shape_cast %45 : vector<8x8x64xf32> to vector<64x64xf32>
    %c0_40 = arith.constant 0 : index
    %c320 = arith.constant 320 : index
    %47 = vector.load %arg10[%c0_40, %c320] : memref<64x576xf32, #tpu.memory_space<vmem>>, vector<64x64xf32>
    tpu.vector_store %arg10[%c0_40, %c320], %46 {strides = array<i32>} : memref<64x576xf32, #tpu.memory_space<vmem>>, vector<64x64xf32>,
    %c2_41 = arith.constant 2 : index
    %c0_42 = arith.constant 0 : index
    %c0_43 = arith.constant 0 : index
    %48 = vector.load %arg9[%c2_41, %c0_42, %c0_43] : memref<10x10x64xf32, #tpu.memory_space<vmem>>, vector<8x8x64xf32>
    %49 = vector.shape_cast %48 : vector<8x8x64xf32> to vector<64x64xf32>
    %c0_44 = arith.constant 0 : index
    %c384 = arith.constant 384 : index
    %50 = vector.load %arg10[%c0_44, %c384] : memref<64x576xf32, #tpu.memory_space<vmem>>, vector<64x64xf32>
    tpu.vector_store %arg10[%c0_44, %c384], %49 {strides = array<i32>} : memref<64x576xf32, #tpu.memory_space<vmem>>, vector<64x64xf32>,
    %c2_45 = arith.constant 2 : index
    %c1_46 = arith.constant 1 : index
    %c0_47 = arith.constant 0 : index
    %51 = vector.load %arg9[%c2_45, %c1_46, %c0_47] : memref<10x10x64xf32, #tpu.memory_space<vmem>>, vector<8x8x64xf32>
    %52 = vector.shape_cast %51 : vector<8x8x64xf32> to vector<64x64xf32>
    %c0_48 = arith.constant 0 : index
    %c448 = arith.constant 448 : index
    %53 = vector.load %arg10[%c0_48, %c448] : memref<64x576xf32, #tpu.memory_space<vmem>>, vector<64x64xf32>
    tpu.vector_store %arg10[%c0_48, %c448], %52 {strides = array<i32>} : memref<64x576xf32, #tpu.memory_space<vmem>>, vector<64x64xf32>,
    %c2_49 = arith.constant 2 : index
    %c2_50 = arith.constant 2 : index
    %c0_51 = arith.constant 0 : index
    %54 = vector.load %arg9[%c2_49, %c2_50, %c0_51] : memref<10x10x64xf32, #tpu.memory_space<vmem>>, vector<8x8x64xf32>
    %55 = vector.shape_cast %54 : vector<8x8x64xf32> to vector<64x64xf32>
    %c0_52 = arith.constant 0 : index
    %c512 = arith.constant 512 : index
    %56 = vector.load %arg10[%c0_52, %c512] : memref<64x576xf32, #tpu.memory_space<vmem>>, vector<64x64xf32>
    tpu.vector_store %arg10[%c0_52, %c512], %55 {strides = array<i32>} : memref<64x576xf32, #tpu.memory_space<vmem>>, vector<64x64xf32>,
    %c0_53 = arith.constant 0 : index
    %c0_54 = arith.constant 0 : index
    %57 = vector.load %arg10[%c0_53, %c0_54] : memref<64x576xf32, #tpu.memory_space<vmem>>, vector<64x576xf32>
    %c0_55 = arith.constant 0 : index
    %c0_56 = arith.constant 0 : index
    %58 = vector.load %arg6[%c0_55, %c0_56] : memref<576x128xf32, #tpu.memory_space<vmem>>, vector<576x128xf32>
    %cst_57 = arith.constant dense<0.000000e+00> : vector<64x128xf32>
    %59 = tpu.matmul %57, %58, %cst_57 {dimension_numbers = #tpu.dot_dimension_numbers<[1], [0], [0], [1], [0, 0, 1, 1], [], []>} : vector<64x576xf32>, vector<576x128xf32>, vector<64x128xf32> -> vector<64x128xf32>
    %c0_58 = arith.constant 0 : index
    %c0_59 = arith.constant 0 : index
    %60 = vector.load %arg7[%c0_58, %c0_59] : memref<1x128xf32, #tpu.memory_space<vmem>>, vector<1x128xf32>
    %61 = vector.broadcast %60 : vector<1x128xf32> to vector<64x128xf32>
    %62 = arith.addf %59, %61 : vector<64x128xf32>
    %c0_60 = arith.constant 0 : index
    %c0_61 = arith.constant 0 : index
    %c0_62 = arith.constant 0 : index
    %63 = vector.load %arg8[%c0_60, %c0_61, %c0_62] : memref<1x64x128xf32, #tpu.memory_space<vmem>>, vector<1x64x128xf32>
    %64 = vector.shape_cast %63 : vector<1x64x128xf32> to vector<64x128xf32>
    %65 = vector.shape_cast %62 : vector<64x128xf32> to vector<1x64x128xf32>
    tpu.vector_store %arg8[%c0_60, %c0_61, %c0_62], %65 {strides = array<i32>} : memref<1x64x128xf32, #tpu.memory_space<vmem>>, vector<1x64x128xf32>,
    return
  }
  func.func @transform_0(%arg0: i32) -> (i32, i32, i32) {
    %c0_i32 = arith.constant 0 : i32
    %c0_i32_0 = arith.constant 0 : i32
    %c0_i32_1 = arith.constant 0 : i32
    return %arg0, %c0_i32, %c0_i32_0 : i32, i32, i32
  }
  func.func @transform_1(%arg0: i32) -> (i32, i32) {
    %c0_i32 = arith.constant 0 : i32
    %c0_i32_0 = arith.constant 0 : i32
    %c0_i32_1 = arith.constant 0 : i32
    return %c0_i32, %c0_i32_0 : i32, i32
  }
  func.func @transform_2(%arg0: i32) -> (i32, i32) {
    %c0_i32 = arith.constant 0 : i32
    %c0_i32_0 = arith.constant 0 : i32
    %c0_i32_1 = arith.constant 0 : i32
    return %c0_i32, %c0_i32_0 : i32, i32
  }
  func.func @transform_3(%arg0: i32) -> (i32, i32) {
    %c0_i32 = arith.constant 0 : i32
    %c0_i32_0 = arith.constant 0 : i32
    %c0_i32_1 = arith.constant 0 : i32
    return %c0_i32, %c0_i32_0 : i32, i32
  }
  func.func @transform_4(%arg0: i32) -> (i32, i32) {
    %c0_i32 = arith.constant 0 : i32
    %c0_i32_0 = arith.constant 0 : i32
    %c0_i32_1 = arith.constant 0 : i32
    return %c0_i32, %c0_i32_0 : i32, i32
  }
  func.func @transform_5(%arg0: i32) -> (i32, i32) {
    %c0_i32 = arith.constant 0 : i32
    %c0_i32_0 = arith.constant 0 : i32
    %c0_i32_1 = arith.constant 0 : i32
    return %c0_i32, %c0_i32_0 : i32, i32
  }
  func.func @transform_6(%arg0: i32) -> (i32, i32) {
    %c0_i32 = arith.constant 0 : i32
    %c0_i32_0 = arith.constant 0 : i32
    %c0_i32_1 = arith.constant 0 : i32
    return %c0_i32, %c0_i32_0 : i32, i32
  }
  func.func @transform_7(%arg0: i32) -> (i32, i32, i32) {
    %c0_i32 = arith.constant 0 : i32
    %c0_i32_0 = arith.constant 0 : i32
    %c0_i32_1 = arith.constant 0 : i32
    return %arg0, %c0_i32, %c0_i32_0 : i32, i32, i32
  }
}

</mosaic_0001>

<bundles_post_ra>
// kernel: tpu_custom_call.1
= control target key start
LH: loop header
LB: loop body
LE: loop exit
PB: predicated region body
PF: predicated region fallthrough
CT: control target
= control target key end

     0   :  { %12 = vsyncpa [#allocation5], 0  ;;  %s4979_s0 = inlined_call_operand.vmem [shape: f32[2,256,27], index: 0, kind: input, shape index: {}]   ;;  %s4980_s1 = inlined_call_operand.vmem [shape: f32[27,64], index: 1, kind: input, shape index: {}]   ;;  %s4981_s2 = inlined_call_operand.vmem [shape: f32[1,64], index: 2, kind: input, shape index: {}]   ;;  %s4982_s3 = inlined_call_operand.vmem [shape: f32[1,64], index: 3, kind: input, shape index: {}]   ;;  %s4983_s4 = inlined_call_operand.vmem [shape: f32[1,64], index: 4, kind: input, shape index: {}]   ;;  %s4984_s5 = inlined_call_operand.vmem [shape: f32[576,128], index: 5, kind: input, shape index: {}]   ;;  %s4985_s6 = inlined_call_operand.vmem [shape: f32[1,128], index: 6, kind: input, shape index: {}]   ;;  %s4986_s7 = inlined_call_operand.hbm [shape: f32[2,64,128], index: 7, kind: output, shape index: {}]  }
   0x1   :  { %14 = vsyncpa [#allocation5 + $0x1], 0  ;;  %s3864_s24 = smov 0   ;;  %s3866_s25 = smov 0  }
   0x2   :  { %s3868_s26 = smov 0   ;;  %s3870_s27 = smov 0  }
   0x3 LB: > { %s3885_s28 = sadd.s32 4294967295, %s3816_s27   ;;  %s3274_s29 = sadd.s32 4294967294, %s3816_s27   ;;  %s3816_s27 = sphi %s3870_s27, %s4992_s27   ;;  %s3812_s26 = sphi %s3868_s26, %s4991_s26   ;;  %s3808_s25 = sphi %s3866_s25, %s4990_s25   ;;  %s3804_s24 = sphi %s3864_s24, %s4989_s24  }
   0x4   : > { %s3889_s30 = sadd.s32 1, %s3816_s27   ;;  %s179_s8 = sadd.s32 1, %s3812_s26 }
   0x5   : > { %s176_s9 = ssub.s32 %s3816_s27, %s3889_s30  ;;  %p189_p0 = scmp.ne.s32.totalorder %s3812_s26, %s3808_s25 }
   0x6   : > { %p177_p1 = scmp.eq.s32.totalorder %s176_s9, 0  ;;  %p190_p2 = scmp.eq.s32.totalorder %s3885_s28, 1 }
   0x7   : > { %p195_p3 = scmp.ne.s32.totalorder %s3808_s25, %s3804_s24  ;;  %p196_p4 = scmp.eq.s32.totalorder %s3274_s29, 1 }
   0x8   : > { %s3900_s10 = scalar_select %p177_p1, %s3812_s26, %s179_s8  }
   0x9   : > { %p3902_p5 = por %p190_p2, %p189_p0  ;;  %p3906_p6 = por %p196_p4, %p195_p3 }
   0xa   : > { %p3277_p7 = scmp.ge.s32.totalorder %s3816_s27, 1  ;;  %p240_p8 = scmp.lt.s32.totalorder %s3816_s27, 3 }
   0xc   : > { %p241_p9 = pnand %p3277_p7, %p240_p8 }
   0xd   : > { %p272_p10 = scmp.lt.s32.totalorder (!%p241_p9), %s3885_s28, 1  ;;  %s3820_s20 = smov (!%p241_p9), 64  }
   0xe   : > { %244 = sbr.rel (%p241_p9) target bundleno = 795 (0x31b), region = 48  ;;  %s3460_s15 = sshll.u32 (!%p241_p9), %s3885_s28, 10 }
  0x13   : > { %v312_v0 = vld [vmem:[%s4980_s1 + $0x18] sm:$0x7]  ;;  %vm417_vm0 = vcmask 1042432   ;;  %v311_v1 = vld [vmem:[%s4980_s1 + $0x10] sm:$0xff]  ;;  %v310_v2 = vld [vmem:[%s4980_s1 + $0x8] sm:$0xff]  ;;  %s273_s19 = scalar_select %p272_p10, %s3885_s28, 1  ;;  %v792_v39 = vlaneseq }
  0x14   : > { %3625 = vmatprep.subr.msk.mxu0 %vm417_vm0, %v312_v0  ;;  %v309_v3 = vld [vmem:[%s4980_s1] sm:$0xff]  ;;  %vm320_vm1 = vcmask 220160   ;;  %vm2036_vm2 = vcmask 523264   ;;  %vm2038_vm3 = vcmask 517120   ;;  %v3818_v36 = vmov 0.0   ;;  %s3821_s28 = smov [#allocation4]  }
  0x15   : > { %3626 = vmatpush3.msk.msra.mxu0 %vm417_vm0, %v312_v0  ;;  %s3459_s22 = sshll.u32 %s273_s19, 8  ;;  %2040 = vst.msk [vmem:[#allocation2 + $0x10] sm:$0xff] %vm2036_vm2, %v3818_v36  ;;  %2037 = vst.msk [vmem:[#allocation2] sm:$0xff] %vm2036_vm2, %v3818_v36  ;;  %v3819_v37 = vmov 1983009808   ;;  %v793_v44 = vshrl.u32 %v792_v39, 7  ;;  %s4932_s19 = scalar_lea.hbm %s4986_s7, %s3460_s15 }
  0x16   : > { %3627 = vmatprep.subr.mxu0 %v311_v1  ;;  %s3929_s8 = scalar_lea.vmem %s4979_s0, %s3459_s22  ;;  %2041 = vst.msk [vmem:[#allocation2 + $0x18] sm:$0x3] %vm2038_vm3, %v3818_v36  ;;  %2039 = vst.msk [vmem:[#allocation2 + $0x8] sm:$0x3] %vm2038_vm3, %v3818_v36  ;;  %v790_v38 = vunpack.c.l.s4 %v3819_v37  ;;  %v4018_v40 = vld [vmem:[%s4981_s2] ss:$0 sm:$0xff] }
  0x17   : > { %3628 = vmatpush3.msra.mxu0 %v311_v1  ;;  %v277_v4 = vld [vmem:[%s3929_s8] sm:$0xff]  ;;  %v278_v5 = vld [vmem:[%s3929_s8 + $0x8] sm:$0xff]  ;;  %v279_v6 = vld [vmem:[%s3929_s8 + $0x10] sm:$0xff]  ;;  %2042 = vst.msk [vmem:[#allocation2 + $0x20] sm:$0xff] %vm2036_vm2, %v3818_v36  ;;  %vm2378_vm4 = vcmask 1041409   ;;  %vm2380_vm5 = vcmask 1042434  }
  0x18   : > { %3629 = vmatprep.subr.mxu0 %v310_v2  ;;  %3633 = vmatprep.mubr.msk.f32.mxu0 %vm320_vm1, %v277_v4  ;;  %v280_v7 = vld [vmem:[%s3929_s8 + $0x18] sm:$0xff]  ;;  %v281_v8 = vld [vmem:[%s3929_s8 + $0x20] sm:$0xff]  ;;  %v282_v9 = vld [vmem:[%s3929_s8 + $0x28] sm:$0xff]  ;;  %2043 = vst.msk [vmem:[#allocation2 + $0x28] sm:$0x3] %vm2038_vm3, %v3818_v36  ;;  %v791_v43 = vunpack.c.0.s8 %v790_v38  ;;  %vm2382_vm6 = vcmask 1043459  }
  0x19   : > { %3630 = vmatpush3.msra.mxu0 %v310_v2  ;;  %v283_v10 = vld [vmem:[%s3929_s8 + $0x30] sm:$0xff]  ;;  %v284_v11 = vld [vmem:[%s3929_s8 + $0x38] sm:$0xff]  ;;  %v285_v12 = vld [vmem:[%s3929_s8 + $0x40] sm:$0xff]  ;;  %2044 = vst.msk [vmem:[#allocation2 + $0x30] sm:$0xff] %vm2036_vm2, %v3818_v36  ;;  %vm2384_vm7 = vcmask 1044484   ;;  %vm2386_vm8 = vcmask 1045509  }
  0x1a   : > { %3631 = vmatprep.subr.mxu0 %v309_v3  ;;  %v286_v13 = vld [vmem:[%s3929_s8 + $0x48] sm:$0xff]  ;;  %v287_v14 = vld [vmem:[%s3929_s8 + $0x50] sm:$0xff]  ;;  %v288_v15 = vld [vmem:[%s3929_s8 + $0x58] sm:$0xff]  ;;  %2045 = vst.msk [vmem:[#allocation2 + $0x38] sm:$0x3] %vm2038_vm3, %v3818_v36  ;;  %v4033_v52 = vsub.s32 %v791_v43, %v793_v44  ;;  %vm2388_vm9 = vcmask 1046534  }
  0x1b   : > { %3632 = vmatpush3.msra.mxu0 %v309_v3  ;;  %v289_v16 = vld [vmem:[%s3929_s8 + $0x60] sm:$0xff]  ;;  %v290_v17 = vld [vmem:[%s3929_s8 + $0x68] sm:$0xff]  ;;  %v291_v18 = vld [vmem:[%s3929_s8 + $0x70] sm:$0xff]  ;;  %2046 = vst.msk [vmem:[#allocation2 + $0x40] sm:$0xff] %vm2036_vm2, %v3818_v36  ;;  %vm2390_vm10 = vcmask 1047559   ;;  %vm2514_vm11 = vcmask 1048064  }
  0x1c   : > { %3634 = vmatmul.mubr.msk.f32.vlgmr.msra.gmra.mxu0 %vm320_vm1, %v278_v5  ;;  %v292_v19 = vld [vmem:[%s3929_s8 + $0x78] sm:$0xff]  ;;  %v293_v20 = vld [vmem:[%s3929_s8 + $0x80] sm:$0xff]  ;;  %v294_v21 = vld [vmem:[%s3929_s8 + $0x88] sm:$0xff]  ;;  %2047 = vst.msk [vmem:[#allocation2 + $0x48] sm:$0x3] %vm2038_vm3, %v3818_v36  ;;  %s3760_s23 = sshll.u32 %s3821_s28, 4  ;;  %s3761_s23 = int_to_ptr.vmem [resolvable:$false] %s3760_s23 }
  0x1d   : > { %3636 = vmatprep.mubr.msk.f32.mxu0 %vm320_vm1, %v279_v6  ;;  %v295_v22 = vld [vmem:[%s3929_s8 + $0x90] sm:$0xff]  ;;  %v296_v23 = vld [vmem:[%s3929_s8 + $0x98] sm:$0xff]  ;;  %v297_v24 = vld [vmem:[%s3929_s8 + $0xa0] sm:$0xff]  ;;  %2048 = vst.msk [vmem:[#allocation2 + $0x50] sm:$0xff] %vm2036_vm2, %v3818_v36  ;;  %s3762_s29 = scalar_lea.vmem %s3761_s23, 2048 }
  0x1e   : > { %v298_v25 = vld [vmem:[%s3929_s8 + $0xa8] sm:$0xff]  ;;  %v299_v26 = vld [vmem:[%s3929_s8 + $0xb0] sm:$0xff]  ;;  %v300_v27 = vld [vmem:[%s3929_s8 + $0xb8] sm:$0xff]  ;;  %2049 = vst.msk [vmem:[#allocation2 + $0x58] sm:$0x3] %vm2038_vm3, %v3818_v36 }
  0x1f   : > { %v301_v28 = vld [vmem:[%s3929_s8 + $0xc0] sm:$0xff]  ;;  %v302_v29 = vld [vmem:[%s3929_s8 + $0xc8] sm:$0xff]  ;;  %v303_v30 = vld [vmem:[%s3929_s8 + $0xd0] sm:$0xff]  ;;  %2050 = vst.msk [vmem:[#allocation2 + $0x60] sm:$0xff] %vm2036_vm2, %v3818_v36 }
  0x20   : > { %3637 = vmatmul.mubr.msk.f32.gmra.mxu0 %vm320_vm1, %v280_v7  ;;  %v304_v31 = vld [vmem:[%s3929_s8 + $0xd8] sm:$0xff]  ;;  %v305_v32 = vld [vmem:[%s3929_s8 + $0xe0] sm:$0xff]  ;;  %v306_v33 = vld [vmem:[%s3929_s8 + $0xe8] sm:$0xff]  ;;  %2051 = vst.msk [vmem:[#allocation2 + $0x68] sm:$0x3] %vm2038_vm3, %v3818_v36 }
  0x21   : > { %3639 = vmatprep.mubr.msk.f32.mxu0 %vm320_vm1, %v281_v8  ;;  %v307_v34 = vld [vmem:[%s3929_s8 + $0xf0] sm:$0xff]  ;;  %v308_v35 = vld [vmem:[%s3929_s8 + $0xf8] sm:$0xff]  ;;  %2052 = vst.msk [vmem:[#allocation2 + $0x70] sm:$0xff] %vm2036_vm2, %v3818_v36  ;;  %2054 = vst.msk [vmem:[#allocation2 + $0x80] sm:$0xff] %vm2036_vm2, %v3818_v36 }
  0x22   : > { %2053 = vst.msk [vmem:[#allocation2 + $0x78] sm:$0x3] %vm2038_vm3, %v3818_v36  ;;  %2055 = vst.msk [vmem:[#allocation2 + $0x88] sm:$0x3] %vm2038_vm3, %v3818_v36  ;;  %v4024_v45 = vld [vmem:[%s4982_s3] ss:$0 sm:$0xff] }
  0x23   : > { %2056 = vst.msk [vmem:[#allocation2 + $0x90] sm:$0xff] %vm2036_vm2, %v3818_v36  ;;  %v4030_v49 = vld [vmem:[%s4983_s4] ss:$0 sm:$0xff]  ;;  %v2843_v1 = vld [vmem:[%s4984_s5 + $0x238] sm:$0xff] }
  0x24   : > { %3640 = vmatmul.mubr.msk.f32.gmra.mxu0 %vm320_vm1, %v282_v9  ;;  %2057 = vst.msk [vmem:[#allocation2 + $0x98] sm:$0x3] %vm2038_vm3, %v3818_v36  ;;  %3681 = vmatprep.subr.mxu0 %v2843_v1 }
  0x25   : > { %3642 = vmatprep.mubr.msk.f32.mxu0 %vm320_vm1, %v283_v10  ;;  %3682 = vmatpush3.msra.mxu0 %v2843_v1 }
  0x28   : > { %3643 = vmatmul.mubr.msk.f32.gmra.mxu0 %vm320_vm1, %v284_v11 }
  0x29   : > { %3645 = vmatprep.mubr.msk.f32.mxu0 %vm320_vm1, %v285_v12 }
  0x2c   : > { %3646 = vmatmul.mubr.msk.f32.gmra.mxu0 %vm320_vm1, %v286_v13 }
  0x2d   : > { %3648 = vmatprep.mubr.msk.f32.mxu0 %vm320_vm1, %v287_v14 }
  0x30   : > { %3649 = vmatmul.mubr.msk.f32.gmra.mxu0 %vm320_vm1, %v288_v15 }
  0x31   : > { %3651 = vmatprep.mubr.msk.f32.mxu0 %vm320_vm1, %v289_v16 }
  0x34   : > { %3652 = vmatmul.mubr.msk.f32.gmra.mxu0 %vm320_vm1, %v290_v17  ;;  %v2842_v17 = vld [vmem:[%s4984_s5 + $0x230] sm:$0xff] }
  0x35   : > { %3654 = vmatprep.mubr.msk.f32.mxu0 %vm320_vm1, %v291_v18  ;;  %3683 = vmatprep.subr.mxu0 %v2842_v17 }
  0x36   : > { %3684 = vmatpush3.msra.mxu0 %v2842_v17 }
  0x38   : > { %3655 = vmatmul.mubr.msk.f32.gmra.mxu0 %vm320_vm1, %v292_v19  ;;  %v4055_v19 = vsub.s32 0, %v793_v44 }
  0x39   : > { %3657 = vmatprep.mubr.msk.f32.mxu0 %vm320_vm1, %v293_v20 }
  0x3c   : > { %3658 = vmatmul.mubr.msk.f32.gmra.mxu0 %vm320_vm1, %v294_v21 }
  0x3d   : > { %3660 = vmatprep.mubr.msk.f32.mxu0 %vm320_vm1, %v295_v22 }
  0x40   : > { %3661 = vmatmul.mubr.msk.f32.gmra.mxu0 %vm320_vm1, %v296_v23 }
  0x41   : > { %3663 = vmatprep.mubr.msk.f32.mxu0 %vm320_vm1, %v297_v24 }
  0x44   : > { %3664 = vmatmul.mubr.msk.f32.gmra.mxu0 %vm320_vm1, %v298_v25 }
  0x45   : > { %3666 = vmatprep.mubr.msk.f32.mxu0 %vm320_vm1, %v299_v26 }
  0x48   : > { %3667 = vmatmul.mubr.msk.f32.gmra.mxu0 %vm320_vm1, %v300_v27 }
  0x49   : > { %3669 = vmatprep.mubr.msk.f32.mxu0 %vm320_vm1, %v301_v28 }
  0x4c   : > { %3670 = vmatmul.mubr.msk.f32.gmra.mxu0 %vm320_vm1, %v302_v29 }
  0x4d   : > { %3672 = vmatprep.mubr.msk.f32.mxu0 %vm320_vm1, %v303_v30 }
  0x50   : > { %3673 = vmatmul.mubr.msk.f32.gmra.mxu0 %vm320_vm1, %v304_v31 }
  0x51   : > { %3675 = vmatprep.mubr.msk.f32.mxu0 %vm320_vm1, %v305_v32 }
  0x54   : > { %3676 = vmatmul.mubr.msk.f32.gmra.mxu0 %vm320_vm1, %v306_v33 }
  0x55   : > { %3678 = vmatprep.mubr.msk.f32.mxu0 %vm320_vm1, %v307_v34 }
  0x58   : > { %3679 = vmatmul.mubr.msk.f32.gmra.mxu0 %vm320_vm1, %v308_v35 }
  0xdc   : > { %v3635_v41 = vpop.f32.mrf.mxu0 }
  0xdd   : > { %v493_v42 = vadd.f32 %v3635_v41, %v4018_v40 }
  0xde   : > { %v487_v46 = vpop.f32.mrf.mxu0 }
  0xdf   : > { %v647_v47 = vmax.f32 %v493_v42, 0.0  ;;  %v488_v48 = vadd.f32 %v4018_v40, %v487_v46 }
  0xe0   : > { %v3638_v50 = vpop.f32.mrf.mxu0 }
  0xe1   : > { %v686_v51 = vmul.f32 %v4024_v45, %v647_v47  ;;  %v646_v53 = vmax.f32 %v488_v48, 0.0  ;;  %v503_v54 = vadd.f32 %v3638_v50, %v4018_v40  ;;  %v2841_v47 = vld [vmem:[%s4984_s5 + $0x228] sm:$0xff] }
  0xe2   : > { %v497_v55 = vpop.f32.mrf.mxu0  ;;  %3685 = vmatprep.subr.mxu0 %v2841_v47 }
  0xe3   : > { %v725_v56 = vadd.f32 %v4030_v49, %v686_v51  ;;  %v685_v57 = vmul.f32 %v4024_v45, %v646_v53  ;;  %v649_v58 = vmax.f32 %v503_v54, 0.0  ;;  %v498_v59 = vadd.f32 %v4018_v40, %v497_v55  ;;  %3686 = vmatpush3.msra.mxu0 %v2841_v47 }
  0xe4   : > { %v3641_v0 = vpop.f32.mrf.mxu0 }
  0xe5   : > { %v805_v60 = vcombine.high %v725_v56, %v725_v56  ;;  %v812_v61 = vrot.slane %v725_v56, %v4033_v52  ;;  %v724_v62 = vadd.f32 %v4030_v49, %v685_v57  ;;  %v688_v63 = vmul.f32 %v4024_v45, %v649_v58 }
  0xe6   : > { %v648_v2 = vmax.f32 %v498_v59, 0.0  ;;  %v513_v9 = vadd.f32 %v3641_v0, %v4018_v40  ;;  %v507_v32 = vpop.f32.mrf.mxu0 }
  0xe7   : > { %v819_v3 = vrot.slane %v805_v60, %v4033_v52  ;;  %v820_v4 = vcombine.high %v812_v61, %v812_v61  ;;  %v788_v5 = vcombine.high %v724_v62, %v724_v62  ;;  %v3321_v6 = vrot.slane %v812_v61, 9 }
  0xe8   : > { %v795_v7 = vrot.slane %v724_v62, %v4033_v52  ;;  %v727_v8 = vadd.f32 %v4030_v49, %v688_v63  ;;  %v687_v12 = vmul.f32 %v4024_v45, %v648_v2  ;;  %v651_v23 = vmax.f32 %v513_v9, 0.0  ;;  %v3644_v54 = vpop.f32.mrf.mxu0  ;;  %v2840_v63 = vld [vmem:[%s4984_s5 + $0x220] sm:$0xff] }
  0xe9   : > { %v821_v10 = vcombine.high %v819_v3, %v819_v3  ;;  %v3322_v11 = vrot.slane %v820_v4, 9  ;;  %v3323_v13 = vrot.slane %v819_v3, 9  ;;  %v802_v14 = vrot.slane %v788_v5, %v4033_v52  ;;  %3687 = vmatprep.subr.mxu0 %v2840_v63 }
  0xea   : > { %v803_v15 = vcombine.high %v795_v7, %v795_v7  ;;  %v839_v16 = vcombine.high %v727_v8, %v727_v8  ;;  %v846_v18 = vrot.slane %v727_v8, %v4033_v52  ;;  %v4057_v21 = vmax.f32 %v812_v61, %v3321_v6  ;;  %v517_v8 = vpop.f32.mrf.mxu0  ;;  %3688 = vmatpush3.msra.mxu0 %v2840_v63 }
  0xeb   : > { %v3324_v20 = vrot.slane %v821_v10, 9  ;;  %v3317_v22 = vrot.slane %v795_v7, 9  ;;  %v4059_v24 = vmax.f32 %v820_v4, %v3322_v11  ;;  %v4062_v28 = vmax.f32 %v819_v3, %v3323_v13 }
  0xec   : > { %v853_v25 = vrot.slane %v839_v16, %v4033_v52  ;;  %v854_v26 = vcombine.high %v846_v18, %v846_v18  ;;  %v3385_v27 = vrot.slane %v846_v18, 9  ;;  %v804_v29 = vcombine.high %v802_v14, %v802_v14 }
  0xed   : > { %v3318_v30 = vrot.slane %v803_v15, 9  ;;  %v726_v31 = vadd.f32 %v4030_v49, %v687_v12  ;;  %v3319_v33 = vrot.slane %v802_v14, 9  ;;  %v1652_v37 = vmax.f32 %v795_v7, %v3317_v22 }
  0xee   : > { %v855_v34 = vcombine.high %v853_v25, %v853_v25  ;;  %v3386_v35 = vrot.slane %v854_v26, 9  ;;  %v3387_v36 = vrot.slane %v853_v25, 9  ;;  %v690_v41 = vmul.f32 %v4024_v45, %v651_v23 }
  0xef   : > { %v822_v38 = vcombine.high %v726_v31, %v726_v31  ;;  %v829_v39 = vrot.slane %v726_v31, %v4033_v52  ;;  %v1659_v42 = vmax.f32 %v821_v10, %v3324_v20  ;;  %v1912_v44 = vmax.f32 %v846_v18, %v3385_v27 }
  0xf0   : > { %v3388_v43 = vrot.slane %v855_v34, 9  ;;  %v1913_v46 = vmax.f32 %v854_v26, %v3386_v35  ;;  %v729_v53 = vadd.f32 %v4030_v49, %v690_v41  ;;  %v3320_v55 = vrot.slane %v804_v29, 9 }
  0xf1   : > { %v836_v48 = vrot.slane %v822_v38, %v4033_v52  ;;  %v837_v50 = vcombine.high %v829_v39, %v829_v39  ;;  %v3381_v51 = vrot.slane %v829_v39, 9  ;;  %v1653_v56 = vmax.f32 %v803_v15, %v3318_v30  ;;  %v2839_v30 = vld [vmem:[%s4984_s5 + $0x218] sm:$0xff] }
  0xf2   : > { %v1914_v57 = vmax.f32 %v853_v25, %v3387_v36  ;;  %v1915_v58 = vmax.f32 %v855_v34, %v3388_v43  ;;  %v1654_v0 = vmax.f32 %v802_v14, %v3319_v33  ;;  %v1976_v1 = vmax.f32 %v4057_v21, %v1912_v44  ;;  %v3647_v25 = vpop.f32.mrf.mxu0  ;;  %3689 = vmatprep.subr.mxu0 %v2839_v30 }
  0xf3   : > { %v838_v59 = vcombine.high %v836_v48, %v836_v48  ;;  %v3382_v60 = vrot.slane %v837_v50, 9  ;;  %v3383_v61 = vrot.slane %v836_v48, 9  ;;  %v1908_v62 = vmax.f32 %v829_v39, %v3381_v51  ;;  %3690 = vmatpush3.msra.mxu0 %v2839_v30 }
  0xf4   : > { %v1977_v2 = vmax.f32 %v4059_v24, %v1913_v46  ;;  %v873_v3 = vcombine.high %v729_v53, %v729_v53  ;;  %v1978_v9 = vmax.f32 %v4062_v28, %v1914_v57  ;;  %v1979_v10 = vmax.f32 %v1659_v42, %v1915_v58  ;;  %v527_v44 = vpop.f32.mrf.mxu0 }
  0xf5   : > { %v3384_v4 = vrot.slane %v838_v59, 9  ;;  %v1909_v5 = vmax.f32 %v837_v50, %v3382_v60  ;;  %v1910_v6 = vmax.f32 %v836_v48, %v3383_v61  ;;  %v1972_v7 = vmax.f32 %v1652_v37, %v1908_v62 }
  0xf6   : > { %v880_v11 = vrot.slane %v729_v53, %v4033_v52  ;;  %v508_v12 = vadd.f32 %v4018_v40, %v507_v32  ;;  %v1655_v13 = vmax.f32 %v804_v29, %v3320_v55  ;;  %v2141_v17 = vrot.slane %v1976_v1, %v4055_v19 }
  0xf7   : > { %v1911_v14 = vmax.f32 %v838_v59, %v3384_v4  ;;  %v1973_v15 = vmax.f32 %v1653_v56, %v1909_v5  ;;  %v1974_v16 = vmax.f32 %v1654_v0, %v1910_v6  ;;  %v2125_v18 = vrot.slane %v1972_v7, %v4055_v19  ;;  %v2838_v0 = vld [vmem:[%s4984_s5 + $0x210] sm:$0xff] }
  0xf8   : > { %v887_v20 = vrot.slane %v873_v3, %v4033_v52  ;;  %v650_v24 = vmax.f32 %v508_v12, 0.0  ;;  %v2145_v26 = vrot.slane %v1977_v2, %v4055_v19  ;;  %v2149_v27 = vrot.slane %v1978_v9, %v4055_v19  ;;  %3691 = vmatprep.subr.mxu0 %v2838_v0 }
  0xf9   : > { %v1975_v21 = vmax.f32 %v1655_v13, %v1911_v14  ;;  %v2129_v22 = vrot.slane %v1973_v15, %v4055_v19  ;;  %v2133_v23 = vrot.slane %v1974_v16, %v4055_v19  ;;  %v2153_v28 = vrot.slane %v1979_v10, %v4055_v19  ;;  %3692 = vmatpush3.msra.mxu0 %v2838_v0  ;;  %v2837_v13 = vld [vmem:[%s4984_s5 + $0x208] sm:$0xff] }
  0xfa   : > { %v4088_v29 = vcombine.high %v880_v11, %v880_v11  ;;  %v689_v33 = vmul.f32 %v4024_v45, %v650_v24  ;;  %v523_v34 = vadd.f32 %v3644_v54, %v4018_v40  ;;  %v4098_v36 = vcombine.high %v887_v20, %v887_v20  ;;  %3693 = vmatprep.subr.mxu0 %v2837_v13  ;;  %v2836_v24 = vld [vmem:[%s4984_s5 + $0x200] sm:$0xff] }
  0xfb   : > { %v2137_v31 = vrot.slane %v1975_v21, %v4055_v19  ;;  %v2379_v32 = vsel %vm2378_vm4, %v2129_v22, %v2125_v18  ;;  %v3329_v37 = vrot.slane %v880_v11, 9  ;;  %v518_v38 = vadd.f32 %v4018_v40, %v517_v8  ;;  %3694 = vmatpush3.msra.mxu0 %v2837_v13 }
  0xfc   : > { %v2381_v35 = vsel %vm2380_vm5, %v2133_v23, %v2379_v32  ;;  %v728_v41 = vadd.f32 %v4030_v49, %v689_v33  ;;  %v653_v42 = vmax.f32 %v523_v34, 0.0  ;;  %v533_v43 = vadd.f32 %v3647_v25, %v4018_v40  ;;  %3695 = vmatprep.subr.mxu0 %v2836_v24 }
  0xfd   : > { %v2383_v39 = vsel %vm2382_vm6, %v2137_v31, %v2381_v35  ;;  %v3330_v47 = vrot.slane %v4088_v29, 9  ;;  %v3331_v48 = vrot.slane %v887_v20, 9  ;;  %v652_v50 = vmax.f32 %v518_v38, 0.0  ;;  %3696 = vmatpush3.msra.mxu0 %v2836_v24 }
  0xfe   : > { %v2385_v46 = vsel %vm2384_vm7, %v2141_v17, %v2383_v39  ;;  %v856_v53 = vcombine.high %v728_v41, %v728_v41  ;;  %v863_v54 = vrot.slane %v728_v41, %v4033_v52  ;;  %v692_v55 = vmul.f32 %v4024_v45, %v653_v42 }
  0xff   : > { %v2387_v51 = vsel %vm2386_vm8, %v2145_v26, %v2385_v46  ;;  %v691_v57 = vmul.f32 %v4024_v45, %v652_v50  ;;  %v655_v58 = vmax.f32 %v533_v43, 0.0  ;;  %v4112_v59 = vadd.f32 %v4018_v40, %v527_v44 }
 0x100   : > { %v2389_v56 = vsel %vm2388_vm9, %v2149_v27, %v2387_v51  ;;  %v870_v61 = vrot.slane %v856_v53, %v4033_v52  ;;  %v871_v62 = vcombine.high %v863_v54, %v863_v54  ;;  %v3325_v63 = vrot.slane %v863_v54, 9 }
 0x101   : > { %v2391_v60 = vsel %vm2390_vm10, %v2153_v28, %v2389_v56  ;;  %v3332_v1 = vrot.slane %v4098_v36, 9  ;;  %v4120_v2 = vmax.f32 %v880_v11, %v3329_v37  ;;  %v731_v3 = vadd.f32 %v4030_v49, %v692_v55  ;;  %v2474_v55 = vld [vmem:[#allocation2 + $0x1] sm:$0xff] }
 0x102   : > { %v730_v4 = vadd.f32 %v4030_v49, %v691_v57  ;;  %2450 = vst.msk [vmem:[#allocation2 + $0x11] sm:$0xff] %vm2036_vm2, %v2391_v60  ;;  %v872_v5 = vcombine.high %v870_v61, %v870_v61  ;;  %v3326_v6 = vrot.slane %v871_v62, 9  ;;  %v3327_v7 = vrot.slane %v870_v61, 9 }
 0x103   : > { %v694_v8 = vmul.f32 %v4024_v45, %v655_v58  ;;  %v907_v9 = vcombine.high %v731_v3, %v731_v3  ;;  %v914_v10 = vrot.slane %v731_v3, %v4033_v52  ;;  %v4131_v14 = vmax.f32 %v887_v20, %v3331_v48  ;;  %v3650_v48 = vpop.f32.mrf.mxu0 }
 0x104   : > { %v890_v12 = vcombine.high %v730_v4, %v730_v4  ;;  %v897_v11 = vrot.slane %v730_v4, %v4033_v52  ;;  %v3328_v15 = vrot.slane %v872_v5, 9  ;;  %v1660_v16 = vmax.f32 %v863_v54, %v3325_v63 }
 0x105   : > { %v654_v17 = vmax.f32 %v4112_v59, 0.0  ;;  %v921_v18 = vrot.slane %v907_v9, %v4033_v52  ;;  %v922_v21 = vcombine.high %v914_v10, %v914_v10  ;;  %v3393_v22 = vrot.slane %v914_v10, 9 }
 0x106   : > { %v904_v23 = vrot.slane %v890_v12, %v4033_v52  ;;  %v1661_v25 = vmax.f32 %v871_v62, %v3326_v6  ;;  %v1662_v26 = vmax.f32 %v870_v61, %v3327_v7  ;;  %v905_v20 = vcombine.high %v897_v11, %v897_v11  ;;  %v537_v7 = vpop.f32.mrf.mxu0 }
 0x107   : > { %v3389_v27 = vrot.slane %v897_v11, 9  ;;  %v923_v28 = vcombine.high %v921_v18, %v921_v18  ;;  %v3394_v30 = vrot.slane %v922_v21, 9  ;;  %v3395_v31 = vrot.slane %v921_v18, 9 }
 0x108   : > { %v733_v32 = vadd.f32 %v4030_v49, %v694_v8  ;;  %v906_v33 = vcombine.high %v904_v23, %v904_v23  ;;  %v3390_v34 = vrot.slane %v905_v20, 9  ;;  %v3391_v35 = vrot.slane %v904_v23, 9 }
 0x109   : > { %v1916_v37 = vmax.f32 %v897_v11, %v3389_v27  ;;  %v2539_v38 = vld [vmem:[#allocation2 + $0x10] sm:$0xff]  ;;  %v3396_v42 = vrot.slane %v923_v28, 9  ;;  %v1920_v43 = vmax.f32 %v914_v10, %v3393_v22  ;;  %v1921_v44 = vmax.f32 %v922_v21, %v3394_v30 }
 0x10a   : > { %v4140_v39 = vld [vmem:[#allocation2 + $0x11] sm:$0xff]  ;;  %v1922_v46 = vmax.f32 %v921_v18, %v3395_v31  ;;  %2555 = vrot.lane.b32.xlu0 %v2539_v38, %s3820_s20  ;;  %2467 = vst.msk [vmem:[#allocation3 + $0x28] sm:$0xff] %vm2036_vm2, %v2539_v38  ;;  %v3392_v50 = vrot.slane %v906_v33, 9  ;;  %v1917_v51 = vmax.f32 %v905_v20, %v3390_v34  ;;  %v1918_v53 = vmax.f32 %v904_v23, %v3391_v35 }
 0x10b   : > { %v4142_v41 = vld [vmem:[#allocation2 + $0x12] sm:$0xff]  ;;  %2595 = vst.msk [vmem:[#allocation3 + $0x10] sm:$0xff] %vm2036_vm2, %v4140_v39  ;;  %v1980_v54 = vmax.f32 %v1660_v16, %v1916_v37  ;;  %v1665_v56 = vmax.f32 %v4088_v29, %v3330_v47  ;;  %v1663_v57 = vmax.f32 %v872_v5, %v3328_v15  ;;  %v941_v58 = vcombine.high %v733_v32, %v733_v32  ;;  %v3653_v16 = vpop.f32.mrf.mxu0 }
 0x10c   : > { %2532 = vst.msk [vmem:[#allocation3 + $0x30] sm:$0xff] %vm2036_vm2, %v4142_v41  ;;  %v693_v59 = vmul.f32 %v4024_v45, %v654_v17  ;;  %v1923_v60 = vmax.f32 %v923_v28, %v3396_v42  ;;  %v1919_v61 = vmax.f32 %v906_v33, %v3392_v50  ;;  %v1981_v62 = vmax.f32 %v1661_v25, %v1917_v51 }
 0x10d   : > { %v1982_v63 = vmax.f32 %v1662_v26, %v1918_v53  ;;  %v1667_v0 = vmax.f32 %v4098_v36, %v3332_v1  ;;  %v1984_v3 = vmax.f32 %v4120_v2, %v1920_v43  ;;  %v1985_v4 = vmax.f32 %v1665_v56, %v1921_v44  ;;  %v547_v33 = vpop.f32.mrf.mxu0 }
 0x10e   : > { %v1986_v6 = vmax.f32 %v4131_v14, %v1922_v46  ;;  %2490 = vrot.lane.b32.xlu0 %v2474_v55, %s3820_s20  ;;  %v1983_v29 = vmax.f32 %v1663_v57, %v1919_v61  ;;  %v2157_v47 = vrot.slane %v1980_v54, %v4055_v19  ;;  %v2161_v5 = vrot.slane %v1981_v62, %v4055_v19 }
 0x10f   : > { %v2165_v8 = vrot.slane %v1982_v63, %v4055_v19  ;;  %v948_v9 = vrot.slane %v733_v32, %v4033_v52  ;;  %v732_v10 = vadd.f32 %v4030_v49, %v693_v59  ;;  %v543_v36 = vadd.f32 %v3650_v48, %v4018_v40 }
 0x110   : > { %v1987_v1 = vmax.f32 %v1667_v0, %v1923_v60  ;;  %v2169_v2 = vrot.slane %v1983_v29, %v4055_v19  ;;  %v2392_v12 = vsel %vm2378_vm4, %v2161_v5, %v2157_v47  ;;  %v955_v11 = vrot.slane %v941_v58, %v4033_v52  ;;  %v3656_v58 = vpop.f32.mrf.mxu0 }
 0x111   : > { %v2173_v13 = vrot.slane %v1984_v3, %v4055_v19  ;;  %v2393_v14 = vsel %vm2380_vm5, %v2165_v8, %v2392_v12  ;;  %v924_v15 = vcombine.high %v732_v10, %v732_v10  ;;  %v2177_v17 = vrot.slane %v1985_v4, %v4055_v19 }
 0x112   : > { %v2181_v18 = vrot.slane %v1986_v6, %v4055_v19  ;;  %v2394_v21 = vsel %vm2382_vm6, %v2169_v2, %v2393_v14  ;;  %v931_v22 = vrot.slane %v732_v10, %v4033_v52  ;;  %v956_v24 = vcombine.high %v948_v9, %v948_v9 }
 0x113   : > { %v2395_v23 = vsel %vm2384_vm7, %v2173_v13, %v2394_v21  ;;  %v938_v25 = vrot.slane %v924_v15, %v4033_v52  ;;  %v657_v26 = vmax.f32 %v543_v36, 0.0  ;;  %v2185_v20 = vrot.slane %v1987_v1, %v4055_v19 }
 0x114   : > { %v2396_v27 = vsel %vm2386_vm8, %v2177_v17, %v2395_v23  ;;  %v957_v28 = vcombine.high %v955_v11, %v955_v11  ;;  %v3337_v30 = vrot.slane %v948_v9, 9  ;;  %v3339_v35 = vrot.slane %v955_v11, 9 }
 0x115   : > { %v2397_v31 = vsel %vm2388_vm9, %v2181_v18, %v2396_v27  ;;  %v696_v32 = vmul.f32 %v4024_v45, %v657_v26  ;;  %v939_v37 = vcombine.high %v931_v22, %v931_v22  ;;  %v538_v38 = vadd.f32 %v4018_v40, %v537_v7 }
 0x116   : > { %v2398_v34 = vsel %vm2390_vm10, %v2185_v20, %v2397_v31  ;;  %v3338_v42 = vrot.slane %v956_v24, 9  ;;  %v940_v43 = vcombine.high %v938_v25, %v938_v25  ;;  %v553_v46 = vadd.f32 %v3653_v16, %v4018_v40 }
 0x117   : > { %v735_v44 = vadd.f32 %v4030_v49, %v696_v32  ;;  %2451 = vst.msk [vmem:[#allocation2 + $0x21] sm:$0xff] %vm2036_vm2, %v2398_v34  ;;  %v3340_v48 = vrot.slane %v957_v28, 9  ;;  %v4186_v50 = vmax.f32 %v948_v9, %v3337_v30  ;;  %v3333_v51 = vrot.slane %v931_v22, 9 }
 0x118   : > { %v656_v53 = vmax.f32 %v538_v38, 0.0  ;;  %v659_v56 = vmax.f32 %v553_v46, 0.0  ;;  %v548_v57 = vadd.f32 %v4018_v40, %v547_v33  ;;  %v4190_v59 = vmax.f32 %v955_v11, %v3339_v35 }
 0x119   : > { %v975_v54 = vcombine.high %v735_v44, %v735_v44  ;;  %v982_v55 = vrot.slane %v735_v44, %v4033_v52  ;;  %v3334_v60 = vrot.slane %v939_v37, 9  ;;  %v3335_v61 = vrot.slane %v938_v25, 9 }
 0x11a   : > { %v695_v62 = vmul.f32 %v4024_v45, %v656_v53  ;;  %v3336_v63 = vrot.slane %v940_v43, 9  ;;  %v698_v4 = vmul.f32 %v4024_v45, %v659_v56  ;;  %v4195_v6 = vmax.f32 %v956_v24, %v3338_v42 }
 0x11b   : > { %v989_v0 = vrot.slane %v975_v54, %v4033_v52  ;;  %v990_v3 = vcombine.high %v982_v55, %v982_v55  ;;  %v4197_v7 = vmax.f32 %v957_v28, %v3340_v48  ;;  %v563_v47 = vadd.f32 %v3656_v58, %v4018_v40 }
 0x11c   : > { %v734_v29 = vadd.f32 %v4030_v49, %v695_v62  ;;  %v1668_v5 = vmax.f32 %v931_v22, %v3333_v51  ;;  %v3401_v9 = vrot.slane %v982_v55, 9  ;;  %v658_v10 = vmax.f32 %v548_v57, 0.0 }
 0x11d   : > { %v991_v8 = vcombine.high %v989_v0, %v989_v0  ;;  %v1670_v36 = vmax.f32 %v938_v25, %v3335_v61  ;;  %v737_v12 = vadd.f32 %v4030_v49, %v698_v4  ;;  %v1669_v15 = vmax.f32 %v939_v37, %v3334_v60  ;;  %v557_v25 = vpop.f32.mrf.mxu0 }
 0x11e   : > { %v958_v1 = vcombine.high %v734_v29, %v734_v29  ;;  %v965_v2 = vrot.slane %v734_v29, %v4033_v52  ;;  %v2540_v11 = vld [vmem:[#allocation2 + $0x20] sm:$0xff]  ;;  %v1671_v16 = vmax.f32 %v940_v43, %v3336_v63  ;;  %v3402_v17 = vrot.slane %v990_v3, 9 }
 0x11f   : > { %v4203_v13 = vld [vmem:[#allocation2 + $0x22] sm:$0xff]  ;;  %v3403_v18 = vrot.slane %v989_v0, 9  ;;  %2557 = vrot.lane.b32.xlu1 %v2540_v11, %s3820_s20  ;;  %2468 = vst.msk [vmem:[#allocation3 + $0x50] sm:$0xff] %vm2036_vm2, %v2540_v11  ;;  %2660 = vst.msk [vmem:[#allocation3 + $0x18] sm:$0xff] %vm2036_vm2, %v2540_v11  ;;  %v661_v24 = vmax.f32 %v563_v47, 0.0  ;;  %v3404_v26 = vrot.slane %v991_v8, 9  ;;  %v1928_v20 = vmax.f32 %v982_v55, %v3401_v9 }
 0x120   : > { %v4205_v14 = vld [vmem:[#allocation2 + $0x21] sm:$0xff]  ;;  %2724 = vst.msk [vmem:[#allocation3 + $0x20] sm:$0xff] %vm2036_vm2, %v4203_v13  ;;  %2533 = vst.msk [vmem:[#allocation3 + $0x58] sm:$0xff] %vm2036_vm2, %v4203_v13  ;;  %v972_v21 = vrot.slane %v958_v1, %v4033_v52  ;;  %v973_v22 = vcombine.high %v965_v2, %v965_v2  ;;  %v3397_v23 = vrot.slane %v965_v2, 9  ;;  %v1009_v27 = vcombine.high %v737_v12, %v737_v12 }
 0x121   : > { %2596 = vst.msk [vmem:[#allocation3 + $0x38] sm:$0xff] %vm2036_vm2, %v4205_v14  ;;  %v697_v28 = vmul.f32 %v4024_v45, %v658_v10  ;;  %v1929_v34 = vmax.f32 %v990_v3, %v3402_v17  ;;  %v1930_v35 = vmax.f32 %v989_v0, %v3403_v18  ;;  %v1016_v37 = vrot.slane %v737_v12, %v4033_v52 }
 0x122   : > { %v974_v30 = vcombine.high %v972_v21, %v972_v21  ;;  %v3398_v31 = vrot.slane %v973_v22, 9  ;;  %v3399_v32 = vrot.slane %v972_v21, 9  ;;  %v1924_v33 = vmax.f32 %v965_v2, %v3397_v23 }
 0x123   : > { %v558_v38 = vadd.f32 %v4018_v40, %v557_v25  ;;  %2492 = vrot.lane.b32.xlu1 %v4140_v39, %s3820_s20  ;;  %v1931_v48 = vmax.f32 %v991_v8, %v3404_v26  ;;  %v1992_v51 = vmax.f32 %v4186_v50, %v1928_v20  ;;  %v736_v53 = vadd.f32 %v4030_v49, %v697_v28 }
 0x124   : > { %v3400_v42 = vrot.slane %v974_v30, 9  ;;  %v1925_v43 = vmax.f32 %v973_v22, %v3398_v31  ;;  %v1926_v44 = vmax.f32 %v972_v21, %v3399_v32  ;;  %v1988_v46 = vmax.f32 %v1668_v5, %v1924_v33 }
 0x125   : > { %v700_v54 = vmul.f32 %v4024_v45, %v661_v24  ;;  %v1023_v58 = vrot.slane %v1009_v27, %v4033_v52  ;;  %v1993_v61 = vmax.f32 %v4195_v6, %v1929_v34  ;;  %v1994_v39 = vmax.f32 %v4190_v59, %v1930_v35 }
 0x126   : > { %v1927_v55 = vmax.f32 %v974_v30, %v3400_v42  ;;  %v1989_v56 = vmax.f32 %v1669_v15, %v1925_v43  ;;  %v1990_v57 = vmax.f32 %v1670_v36, %v1926_v44  ;;  %v1024_v62 = vcombine.high %v1016_v37, %v1016_v37 }
 0x127   : > { %v2736_v60 = vld [vmem:[#allocation3 + $0x20] sm:$0xff]  ;;  %2494 = vrot.lane.b32.xlu1 %v4205_v14, %s3820_s20  ;;  %v2189_v63 = vrot.slane %v1988_v46, %v4055_v19  ;;  %v1995_v4 = vmax.f32 %v4197_v7, %v1931_v48  ;;  %v2205_v29 = vrot.slane %v1992_v51, %v4055_v19  ;;  %v992_v6 = vcombine.high %v736_v53, %v736_v53  ;;  %v3659_v7 = vpop.f32.mrf.mxu0 }
 0x128   : > { %3697 = vmatprep.mubr.msk.f32.mxu0 %vm2036_vm2, %v2736_v60  ;;  %v1991_v50 = vmax.f32 %v1671_v16, %v1927_v55  ;;  %v2193_v0 = vrot.slane %v1989_v56, %v4055_v19  ;;  %v2197_v3 = vrot.slane %v1990_v57, %v4055_v19  ;;  %v660_v47 = vmax.f32 %v558_v38, 0.0 }
 0x129   : > { %v1025_v8 = vcombine.high %v1023_v58, %v1023_v58  ;;  %v739_v9 = vadd.f32 %v4030_v49, %v700_v54  ;;  %v2209_v10 = vrot.slane %v1993_v61, %v4055_v19  ;;  %v2213_v36 = vrot.slane %v1994_v39, %v4055_v19  ;;  %v567_v30 = vpop.f32.mrf.mxu0 }
 0x12a   : > { %v2201_v59 = vrot.slane %v1991_v50, %v4055_v19  ;;  %v2399_v5 = vsel %vm2378_vm4, %v2193_v0, %v2189_v63  ;;  %v999_v2 = vrot.slane %v736_v53, %v4033_v52  ;;  %v3345_v11 = vrot.slane %v1016_v37, 9 }
 0x12b   : > { %v2400_v1 = vsel %vm2380_vm5, %v2197_v3, %v2399_v5  ;;  %v3346_v15 = vrot.slane %v1024_v62, 9  ;;  %v1043_v16 = vcombine.high %v739_v9, %v739_v9  ;;  %v2217_v17 = vrot.slane %v1995_v4, %v4055_v19  ;;  %v3662_v56 = vpop.f32.mrf.mxu0 }
 0x12c   : > { %v2401_v12 = vsel %vm2382_vm6, %v2201_v59, %v2400_v1  ;;  %v1006_v21 = vrot.slane %v992_v6, %v4033_v52  ;;  %v1050_v22 = vrot.slane %v739_v9, %v4033_v52  ;;  %v3347_v24 = vrot.slane %v1023_v58, 9 }
 0x12d   : > { %v2402_v18 = vsel %vm2384_vm7, %v2205_v29, %v2401_v12  ;;  %v3348_v25 = vrot.slane %v1025_v8, 9  ;;  %v1057_v26 = vrot.slane %v1043_v16, %v4033_v52  ;;  %v1007_v27 = vcombine.high %v999_v2, %v999_v2 }
 0x12e   : > { %v2403_v23 = vsel %vm2386_vm8, %v2209_v10, %v2402_v18  ;;  %v3341_v28 = vrot.slane %v999_v2, 9  ;;  %v4252_v32 = vmax.f32 %v1016_v37, %v3345_v11  ;;  %v4254_v33 = vmax.f32 %v1024_v62, %v3346_v15 }
 0x12f   : > { %v2404_v20 = vsel %vm2388_vm9, %v2213_v36, %v2403_v23  ;;  %v1058_v34 = vcombine.high %v1050_v22, %v1050_v22  ;;  %v1008_v35 = vcombine.high %v1006_v21, %v1006_v21  ;;  %v3343_v38 = vrot.slane %v1006_v21, 9 }
 0x130   : > { %v2405_v31 = vsel %vm2390_vm10, %v2217_v17, %v2404_v20  ;;  %v699_v42 = vmul.f32 %v4024_v45, %v660_v47  ;;  %v573_v43 = vadd.f32 %v3659_v7, %v4018_v40  ;;  %v4259_v44 = vmax.f32 %v1023_v58, %v3347_v24  ;;  %v577_v20 = vpop.f32.mrf.mxu0 }
 0x131   : > { %2452 = vst.msk [vmem:[#allocation2 + $0x31] sm:$0xff] %vm2036_vm2, %v2405_v31  ;;  %v4261_v46 = vmax.f32 %v1025_v8, %v3348_v25  ;;  %v1059_v48 = vcombine.high %v1057_v26, %v1057_v26  ;;  %v568_v51 = vadd.f32 %v4018_v40, %v567_v30  ;;  %v3342_v37 = vrot.slane %v1007_v27, 9 }
 0x132   : > { %v1676_v53 = vmax.f32 %v999_v2, %v3341_v28  ;;  %v738_v54 = vadd.f32 %v4030_v49, %v699_v42  ;;  %v663_v55 = vmax.f32 %v573_v43, 0.0  ;;  %v3409_v57 = vrot.slane %v1050_v22, 9 }
 0x133   : > { %v3410_v60 = vrot.slane %v1058_v34, 9  ;;  %v3411_v61 = vrot.slane %v1057_v26, 9  ;;  %v662_v39 = vmax.f32 %v568_v51, 0.0  ;;  %v3344_v62 = vrot.slane %v1008_v35, 9 }
 0x134   : > { %v1678_v50 = vmax.f32 %v1006_v21, %v3343_v38  ;;  %v1026_v63 = vcombine.high %v738_v54, %v738_v54  ;;  %v1033_v58 = vrot.slane %v738_v54, %v4033_v52  ;;  %v3412_v0 = vrot.slane %v1059_v48, 9 }
 0x135   : > { %v702_v3 = vmul.f32 %v4024_v45, %v663_v55  ;;  %v701_v4 = vmul.f32 %v4024_v45, %v662_v39  ;;  %v583_v29 = vadd.f32 %v3662_v56, %v4018_v40  ;;  %v1677_v6 = vmax.f32 %v1007_v27, %v3342_v37  ;;  %v3665_v55 = vpop.f32.mrf.mxu0 }
 0x136   : > { %v1040_v47 = vrot.slane %v1026_v63, %v4033_v52  ;;  %v1041_v59 = vcombine.high %v1033_v58, %v1033_v58  ;;  %v3405_v5 = vrot.slane %v1033_v58, 9  ;;  %v1936_v8 = vmax.f32 %v1050_v22, %v3409_v57 }
 0x137   : > { %v1937_v9 = vmax.f32 %v1058_v34, %v3410_v60  ;;  %v1938_v10 = vmax.f32 %v1057_v26, %v3411_v61  ;;  %v741_v36 = vadd.f32 %v4030_v49, %v702_v3  ;;  %v1939_v17 = vmax.f32 %v1059_v48, %v3412_v0 }
 0x138   : > { %v2541_v1 = vld [vmem:[#allocation2 + $0x30] sm:$0xff]  ;;  %v1042_v12 = vcombine.high %v1040_v47, %v1040_v47  ;;  %v3406_v11 = vrot.slane %v1041_v59, 9  ;;  %v3407_v15 = vrot.slane %v1040_v47, 9  ;;  %v1932_v16 = vmax.f32 %v1033_v58, %v3405_v5 }
 0x139   : > { %v4271_v2 = vld [vmem:[#allocation2 + $0x31] sm:$0xff]  ;;  %2559 = vrot.lane.b32.xlu0 %v2541_v1, %s3820_s20  ;;  %2469 = vst.msk [vmem:[#allocation3 + $0x78] sm:$0xff] %vm2036_vm2, %v2541_v1  ;;  %2661 = vst.msk [vmem:[#allocation3 + $0x40] sm:$0xff] %vm2036_vm2, %v2541_v1  ;;  %v1077_v18 = vcombine.high %v741_v36, %v741_v36  ;;  %v740_v21 = vadd.f32 %v4030_v49, %v701_v4  ;;  %v665_v22 = vmax.f32 %v583_v29, 0.0 }
 0x13a   : > { %v4273_v7 = vld [vmem:[#allocation2 + $0x32] sm:$0xff]  ;;  %2496 = vrot.lane.b32.xlu1 %v4271_v2, %s3820_s20  ;;  %2597 = vst.msk [vmem:[#allocation3 + $0x60] sm:$0xff] %vm2036_vm2, %v4271_v2  ;;  %v3408_v23 = vrot.slane %v1042_v12, 9  ;;  %v1933_v24 = vmax.f32 %v1041_v59, %v3406_v11  ;;  %v1934_v25 = vmax.f32 %v1040_v47, %v3407_v15  ;;  %v1996_v26 = vmax.f32 %v1676_v53, %v1932_v16 }
 0x13b   : > { %2725 = vst.msk [vmem:[#allocation3 + $0x48] sm:$0xff] %vm2036_vm2, %v4273_v7  ;;  %2534 = vst.msk [vmem:[#allocation3 + $0x80] sm:$0xff] %vm2036_vm2, %v4273_v7  ;;  %v1679_v27 = vmax.f32 %v1008_v35, %v3344_v62  ;;  %v2000_v28 = vmax.f32 %v4252_v32, %v1936_v8  ;;  %v2002_v30 = vmax.f32 %v4259_v44, %v1938_v10 }
 0x13c   : > { %v1084_v31 = vrot.slane %v741_v36, %v4033_v52  ;;  %v2001_v34 = vmax.f32 %v4254_v33, %v1937_v9  ;;  %v1935_v38 = vmax.f32 %v1042_v12, %v3408_v23  ;;  %v1997_v42 = vmax.f32 %v1677_v6, %v1933_v24  ;;  %v587_v6 = vpop.f32.mrf.mxu0 }
 0x13d   : > { %v1998_v43 = vmax.f32 %v1678_v50, %v1934_v25  ;;  %v2003_v48 = vmax.f32 %v4261_v46, %v1939_v17  ;;  %v1091_v51 = vrot.slane %v1077_v18, %v4033_v52  ;;  %v1060_v37 = vcombine.high %v740_v21, %v740_v21 }
 0x13e   : > { %v704_v53 = vmul.f32 %v4024_v45, %v665_v22  ;;  %v1999_v54 = vmax.f32 %v1679_v27, %v1935_v38  ;;  %v2221_v35 = vrot.slane %v1996_v26, %v4055_v19  ;;  %v2225_v32 = vrot.slane %v1997_v42, %v4055_v19  ;;  %v3668_v23 = vpop.f32.mrf.mxu0  ;;  %v2803_v27 = vld [vmem:[%s4984_s5 + $0xf8] sm:$0xff]  ;;  %v2786_v42 = vld [vmem:[%s4984_s5 + $0x70] sm:$0xff] }
 0x13f   : > { %v2229_v44 = vrot.slane %v1998_v43, %v4055_v19  ;;  %v1092_v56 = vcombine.high %v1084_v31, %v1084_v31  ;;  %v1067_v33 = vrot.slane %v740_v21, %v4033_v52  ;;  %v2237_v60 = vrot.slane %v2000_v28, %v4055_v19  ;;  %v2787_v28 = vld [vmem:[%s4984_s5 + $0x78] sm:$0xff]  ;;  %3497 = vmatprep.subr.mxu1 %v2803_v27 }
 0x140   : > { %v2245_v46 = vrot.slane %v2002_v30, %v4055_v19  ;;  %v2233_v61 = vrot.slane %v1999_v54, %v4055_v19  ;;  %v2406_v39 = vsel %vm2378_vm4, %v2225_v32, %v2221_v35  ;;  %v2241_v62 = vrot.slane %v2001_v34, %v4055_v19  ;;  %3498 = vmatpush3.msra.mxu1 %v2787_v28  ;;  %v2801_v35 = vld [vmem:[%s4984_s5 + $0xe8] sm:$0xff] }
 0x141   : > { %v2249_v50 = vrot.slane %v2003_v48, %v4055_v19  ;;  %v2407_v63 = vsel %vm2380_vm5, %v2229_v44, %v2406_v39  ;;  %v3353_v58 = vrot.slane %v1084_v31, 9  ;;  %v4307_v3 = vcombine.high %v1091_v51, %v1091_v51  ;;  %v2785_v44 = vld [vmem:[%s4984_s5 + $0x68] sm:$0xff] }
 0x142   : > { %v2741_v57 = vld [vmem:[#allocation3 + $0x48] sm:$0xff]  ;;  %v2408_v0 = vsel %vm2382_vm6, %v2233_v61, %v2407_v63  ;;  %v1074_v4 = vrot.slane %v1060_v37, %v4033_v52  ;;  %v743_v29 = vadd.f32 %v4030_v49, %v704_v53  ;;  %v3354_v59 = vrot.slane %v1092_v56, 9  ;;  %v4350_v53 = vld [vmem:[%s4981_s2] ss:$0 sm:$0xff] }
 0x143   : > { %3698 = vmatmul.mubr.msk.f32.vlgmr.msra.gmra.mxu0 %vm2036_vm2, %v2741_v57  ;;  %v2409_v47 = vsel %vm2384_vm7, %v2237_v60, %v2408_v0  ;;  %v1075_v5 = vcombine.high %v1067_v33, %v1067_v33  ;;  %v578_v8 = vadd.f32 %v4018_v40, %v577_v20  ;;  %v593_v1 = vadd.f32 %v3665_v55, %v4018_v40  ;;  %v4370_v60 = vld [vmem:[%s4983_s4] ss:$0 sm:$0xff]  ;;  %v2523_v63 = vld [vmem:[#allocation2 + $0x2] sm:$0xff] }
 0x144   : > { %v2410_v9 = vsel %vm2386_vm8, %v2241_v62, %v2409_v47  ;;  %v1111_v10 = vcombine.high %v743_v29, %v743_v29  ;;  %v1118_v36 = vrot.slane %v743_v29, %v4033_v52  ;;  %v3355_v11 = vrot.slane %v1091_v51, 9  ;;  %v2800_v61 = vld [vmem:[%s4984_s5 + $0xe0] sm:$0xff]  ;;  %2531 = vst.msk [vmem:[#allocation3 + $0x8] sm:$0xff] %vm2036_vm2, %v2523_v63 }
 0x145   : > { %v2411_v12 = vsel %vm2388_vm9, %v2245_v46, %v2410_v9  ;;  %v4317_v15 = vmax.f32 %v1084_v31, %v3353_v58  ;;  %v664_v16 = vmax.f32 %v578_v8, 0.0  ;;  %v4320_v18 = vcombine.high %v1074_v4, %v1074_v4  ;;  %v2784_v47 = vld [vmem:[%s4984_s5 + $0x60] sm:$0xff] }
 0x146   : > { %v2412_v17 = vsel %vm2390_vm10, %v2249_v50, %v2411_v12  ;;  %v4323_v21 = vrot.slane %v1111_v10, %v4033_v52  ;;  %v588_v22 = vadd.f32 %v4018_v40, %v587_v6  ;;  %v3356_v24 = vrot.slane %v4307_v3, 9  ;;  %v2802_v40 = vld [vmem:[%s4984_s5 + $0xf0] sm:$0xff]  ;;  %v4393_v9 = vld [vmem:[%s4982_s3] ss:$0 sm:$0xff] }
 0x147   : > { %v3349_v25 = vrot.slane %v1067_v33, 9  ;;  %v703_v26 = vmul.f32 %v4024_v45, %v664_v16  ;;  %v667_v20 = vmax.f32 %v593_v1, 0.0  ;;  %2453 = vst.msk [vmem:[#allocation2 + $0x41] sm:$0xff] %vm2036_vm2, %v2412_v17  ;;  %v4338_v30 = vmax.f32 %v1092_v56, %v3354_v59  ;;  %3499 = vmatprep.subr.mxu1 %v2802_v40  ;;  %v597_v40 = vpop.f32.mrf.mxu0 }
 0x148   : > { %v3350_v31 = vrot.slane %v1075_v5, 9  ;;  %v3351_v34 = vrot.slane %v1074_v4, 9  ;;  %v1126_v38 = vcombine.high %v1118_v36, %v1118_v36  ;;  %v4343_v43 = vmax.f32 %v1091_v51, %v3355_v11  ;;  %3500 = vmatpush3.msra.mxu1 %v2786_v42 }
 0x149   : > { %v742_v48 = vadd.f32 %v4030_v49, %v703_v26  ;;  %v706_v37 = vmul.f32 %v4024_v45, %v667_v20  ;;  %v4353_v54 = vadd.f32 %v4350_v53, %v3668_v23  ;;  %v3352_v51 = vrot.slane %v4320_v18, 9  ;;  %3501 = vmatprep.subr.mxu1 %v2801_v35 }
 0x14a   : > { %v1127_v49 = vcombine.high %v4323_v21, %v4323_v21  ;;  %v3417_v32 = vrot.slane %v1118_v36, 9  ;;  %v666_v45 = vmax.f32 %v588_v22, 0.0  ;;  %v4364_v55 = vmax.f32 %v1067_v33, %v3349_v25  ;;  %3502 = vmatpush3.msra.mxu1 %v2785_v44  ;;  %v2458_v25 = vld [vmem:[#allocation2] sm:$0xff] }
 0x14b   : > { %v1094_v56 = vcombine.high %v742_v48, %v742_v48  ;;  %v1101_v57 = vrot.slane %v742_v48, %v4033_v52  ;;  %v745_v46 = vadd.f32 %v4370_v60, %v706_v37  ;;  %v4376_v39 = vmax.f32 %v1075_v5, %v3350_v31  ;;  %3503 = vmatprep.subr.mxu1 %v2800_v61  ;;  %v2798_v31 = vld [vmem:[%s4984_s5 + $0xd0] sm:$0xff]  ;;  %v4451_v61 = vpop.f32.mrf.mxu0 }
 0x14c   : > { %v4378_v62 = vmax.f32 %v1074_v4, %v3351_v34  ;;  %v3418_v33 = vrot.slane %v1126_v38, 9  ;;  %v3419_v50 = vrot.slane %v4323_v21, 9  ;;  %v669_v6 = vmax.f32 %v4353_v54, 0.0  ;;  %v2799_v4 = vld [vmem:[%s4984_s5 + $0xd8] sm:$0xff]  ;;  %3504 = vmatpush3.msra.mxu1 %v2784_v47  ;;  %2466 = vst.msk [vmem:[#allocation3] sm:$0xff] %vm2036_vm2, %v2458_v25 }
 0x14d   : > { %v1108_v58 = vrot.slane %v1094_v56, %v4033_v52  ;;  %v1109_v0 = vcombine.high %v1101_v57, %v1101_v57  ;;  %v3413_v29 = vrot.slane %v1101_v57, 9  ;;  %v3420_v59 = vrot.slane %v1127_v49, 9  ;;  %3505 = vmatprep.subr.mxu1 %v2799_v4 }
 0x14e   : > { %v1944_v5 = vmax.f32 %v1118_v36, %v3417_v32  ;;  %v1145_v8 = vcombine.high %v745_v46, %v745_v46  ;;  %v705_v10 = vmul.f32 %v4393_v9, %v666_v45  ;;  %v2542_v1 = vld [vmem:[#allocation2 + $0x40] sm:$0xff]  ;;  %v2783_v36 = vld [vmem:[%s4984_s5 + $0x58] sm:$0xff]  ;;  %v1687_v26 = vmax.f32 %v4320_v18, %v3352_v51  ;;  %v2797_v51 = vld [vmem:[%s4984_s5 + $0xc8] sm:$0xff] }
 0x14f   : > { %v4396_v12 = vld [vmem:[#allocation2 + $0x41] sm:$0xff]  ;;  %v1110_v16 = vcombine.high %v1108_v58, %v1108_v58  ;;  %v3414_v17 = vrot.slane %v1109_v0, 9  ;;  %v3415_v22 = vrot.slane %v1108_v58, 9  ;;  %v1940_v23 = vmax.f32 %v1101_v57, %v3413_v29  ;;  %2561 = vrot.lane.b32.xlu0 %v2542_v1, %s3820_s20  ;;  %2470 = vst.msk [vmem:[#allocation3 + $0xa0] sm:$0xff] %vm2036_vm2, %v2542_v1  ;;  %2662 = vst.msk [vmem:[#allocation3 + $0x68] sm:$0xff] %vm2036_vm2, %v2542_v1  ;;  %v2795_v29 = vld [vmem:[%s4984_s5 + $0xb8] sm:$0xff] }
 0x150   : > { %v4398_v11 = vld [vmem:[#allocation2 + $0x42] sm:$0xff]  ;;  %2498 = vrot.lane.b32.xlu1 %v4396_v12, %s3820_s20  ;;  %2598 = vst.msk [vmem:[#allocation3 + $0x88] sm:$0xff] %vm2036_vm2, %v4396_v12  ;;  %v1945_v20 = vmax.f32 %v1126_v38, %v3418_v33  ;;  %v4416_v27 = vmax.f32 %v4323_v21, %v3419_v50  ;;  %v4419_v28 = vrot.slane %v745_v46, %v4033_v52  ;;  %v2782_v21 = vld [vmem:[%s4984_s5 + $0x50] sm:$0xff] }
 0x151   : > { %2726 = vst.msk [vmem:[#allocation3 + $0x70] sm:$0xff] %vm2036_vm2, %v4398_v11  ;;  %2535 = vst.msk [vmem:[#allocation3 + $0xa8] sm:$0xff] %vm2036_vm2, %v4398_v11  ;;  %v3416_v34 = vrot.slane %v1110_v16, 9  ;;  %v1941_v42 = vmax.f32 %v1109_v0, %v3414_v17  ;;  %v1942_v48 = vmax.f32 %v1108_v58, %v3415_v22  ;;  %v2004_v18 = vmax.f32 %v4364_v55, %v1940_v23  ;;  %v607_v17 = vpop.f32.mrf.mxu0  ;;  %v2794_v22 = vld [vmem:[%s4984_s5 + $0xb0] sm:$0xff] }
 0x152   : > { %v1947_v38 = vmax.f32 %v1127_v49, %v3420_v59  ;;  %v2008_v37 = vmax.f32 %v4317_v15, %v1944_v5  ;;  %v4431_v54 = vrot.slane %v1145_v8, %v4033_v52  ;;  %v708_v35 = vmul.f32 %v4393_v9, %v669_v6  ;;  %3506 = vmatpush3.msra.mxu1 %v2783_v36  ;;  %v2781_v15 = vld [vmem:[%s4984_s5 + $0x48] sm:$0xff]  ;;  %v2779_v5 = vld [vmem:[%s4984_s5 + $0x38] sm:$0xff] }
 0x153   : > { %v1943_v32 = vmax.f32 %v1110_v16, %v3416_v34  ;;  %v2005_v45 = vmax.f32 %v4376_v39, %v1941_v42  ;;  %v2006_v44 = vmax.f32 %v4378_v62, %v1942_v48  ;;  %v744_v55 = vadd.f32 %v4370_v60, %v705_v10  ;;  %3507 = vmatprep.subr.mxu1 %v2798_v31  ;;  %v2796_v39 = vld [vmem:[%s4984_s5 + $0xc0] sm:$0xff]  ;;  %v2793_v48 = vld [vmem:[%s4984_s5 + $0xa8] sm:$0xff] }
 0x154   : > { %v1691_v49 = vmax.f32 %v4307_v3, %v3356_v24  ;;  %v2009_v56 = vmax.f32 %v4338_v30, %v1945_v20  ;;  %v2010_v57 = vmax.f32 %v4343_v43, %v4416_v27  ;;  %v1160_v46 = vcombine.high %v4419_v28, %v4419_v28  ;;  %3508 = vmatpush3.msra.mxu1 %v2782_v21  ;;  %v2780_v30 = vld [vmem:[%s4984_s5 + $0x40] sm:$0xff]  ;;  %v2778_v20 = vld [vmem:[%s4984_s5 + $0x30] sm:$0xff] }
 0x155   : > { %v2007_v62 = vmax.f32 %v1687_v26, %v1943_v32  ;;  %v2253_v33 = vrot.slane %v2004_v18, %v4055_v19  ;;  %v2257_v3 = vrot.slane %v2005_v45, %v4055_v19  ;;  %v2261_v24 = vrot.slane %v2006_v44, %v4055_v19  ;;  %3509 = vmatprep.subr.mxu1 %v2797_v51  ;;  %v3674_v44 = vpop.f32.mrf.mxu0 }
 0x156   : > { %v2011_v43 = vmax.f32 %v1691_v49, %v1947_v38  ;;  %v2269_v50 = vrot.slane %v2008_v37, %v4055_v19  ;;  %v4465_v63 = vcombine.high %v4431_v54, %v4431_v54  ;;  %v747_v58 = vadd.f32 %v4370_v60, %v708_v35  ;;  %3510 = vmatpush3.msra.mxu1 %v2781_v15  ;;  %v2777_v37 = vld [vmem:[%s4984_s5 + $0x28] sm:$0xff] }
 0x157   : > { %v2265_v6 = vrot.slane %v2007_v62, %v4055_v19  ;;  %v2413_v47 = vsel %vm2378_vm4, %v2257_v3, %v2253_v33  ;;  %v3361_v4 = vrot.slane %v4419_v28, 9  ;;  %v1128_v59 = vcombine.high %v744_v55, %v744_v55  ;;  %3511 = vmatprep.subr.mxu1 %v2796_v39  ;;  %v2791_v33 = vld [vmem:[%s4984_s5 + $0x98] sm:$0xff] }
 0x158   : > { %v2746_v0 = vld [vmem:[#allocation3 + $0x70] sm:$0xff]  ;;  %v2414_v8 = vsel %vm2380_vm5, %v2261_v24, %v2413_v47  ;;  %v3362_v10 = vrot.slane %v1160_v46, 9  ;;  %v3363_v1 = vrot.slane %v4431_v54, 9  ;;  %v1179_v16 = vcombine.high %v747_v58, %v747_v58  ;;  %3512 = vmatpush3.msra.mxu1 %v2780_v30 }
 0x159   : > { %3700 = vmatprep.mubr.msk.f32.mxu0 %vm2036_vm2, %v2746_v0  ;;  %v2273_v23 = vrot.slane %v2009_v56, %v4055_v19  ;;  %v2415_v36 = vsel %vm2382_vm6, %v2265_v6, %v2414_v8  ;;  %v1135_v25 = vrot.slane %v744_v55, %v4033_v52  ;;  %v598_v26 = vadd.f32 %v4350_v53, %v597_v40  ;;  %v2790_v6 = vld [vmem:[%s4984_s5 + $0x90] sm:$0xff] }
 0x15a   : > { %3513 = vmatprep.subr.mxu1 %v2795_v29  ;;  %v2277_v27 = vrot.slane %v2010_v57, %v4055_v19  ;;  %v2281_v31 = vrot.slane %v2011_v43, %v4055_v19  ;;  %v2416_v34 = vsel %vm2384_vm7, %v2269_v50, %v2415_v36  ;;  %v1186_v42 = vrot.slane %v747_v58, %v4033_v52  ;;  %v2776_v57 = vld [vmem:[%s4984_s5 + $0x20] sm:$0xff]  ;;  %v2775_v50 = vld [vmem:[%s4984_s5 + $0x18] sm:$0xff]  ;;  %v2774_v8 = vld [vmem:[%s4984_s5 + $0x10] sm:$0xff] }
 0x15b   : > { %3514 = vmatpush3.msra.mxu1 %v2779_v5  ;;  %v2417_v40 = vsel %vm2386_vm8, %v2273_v23, %v2416_v34  ;;  %v3364_v18 = vrot.slane %v4465_v63, 9  ;;  %v4500_v21 = vmax.f32 %v4419_v28, %v3361_v4  ;;  %v1142_v38 = vrot.slane %v1128_v59, %v4033_v52  ;;  %v2792_v28 = vld [vmem:[%s4984_s5 + $0xa0] sm:$0xff]  ;;  %v2773_v34 = vld [vmem:[%s4984_s5 + $0x8] sm:$0xff] }
 0x15c   : > { %3515 = vmatprep.subr.mxu1 %v2794_v22  ;;  %v2418_v35 = vsel %vm2388_vm9, %v2277_v27, %v2417_v40  ;;  %v4507_v51 = vmax.f32 %v1160_v46, %v3362_v10  ;;  %v4510_v32 = vmax.f32 %v4431_v54, %v3363_v1  ;;  %v1193_v45 = vrot.slane %v1179_v16, %v4033_v52 }
 0x15d   : > { %3516 = vmatpush3.msra.mxu1 %v2778_v20  ;;  %v2419_v55 = vsel %vm2390_vm10, %v2281_v31, %v2418_v35  ;;  %v1143_v15 = vcombine.high %v1135_v25, %v1135_v25  ;;  %v3357_v49 = vrot.slane %v1135_v25, 9  ;;  %v668_v56 = vmax.f32 %v598_v26, 0.0 }
 0x15e   : > { %3517 = vmatprep.subr.mxu1 %v2793_v48  ;;  %v1194_v54 = vcombine.high %v1186_v42, %v1186_v42  ;;  %v3425_v46 = vrot.slane %v1186_v42, 9  ;;  %2454 = vst.msk [vmem:[#allocation2 + $0x51] sm:$0xff] %vm2036_vm2, %v2419_v55  ;;  %v613_v39 = vadd.f32 %v4350_v53, %v4451_v61  ;;  %v608_v62 = vadd.f32 %v4350_v53, %v607_v17 }
 0x15f   : > { %3518 = vmatpush3.msra.mxu1 %v2777_v37  ;;  %v4527_v3 = vcombine.high %v1142_v38, %v1142_v38  ;;  %v3359_v24 = vrot.slane %v1142_v38, 9  ;;  %v707_v30 = vmul.f32 %v4393_v9, %v668_v56  ;;  %v623_v43 = vadd.f32 %v4350_v53, %v3674_v44 }
 0x160   : > { %3519 = vmatprep.subr.mxu1 %v2792_v28  ;;  %v1195_v61 = vcombine.high %v1193_v45, %v1193_v45  ;;  %v3427_v58 = vrot.slane %v1193_v45, 9  ;;  %v671_v0 = vmax.f32 %v613_v39, 0.0  ;;  %v670_v29 = vmax.f32 %v608_v62, 0.0 }
 0x161   : > { %3520 = vmatpush3.msra.mxu1 %v2776_v57  ;;  %v4538_v47 = vmax.f32 %v4465_v63, %v3364_v18  ;;  %v3358_v4 = vrot.slane %v1143_v15, 9  ;;  %v4540_v59 = vmax.f32 %v1135_v25, %v3357_v49  ;;  %v746_v5 = vadd.f32 %v4370_v60, %v707_v30  ;;  %v2789_v63 = vld [vmem:[%s4984_s5 + $0x88] sm:$0xff]  ;;  %v617_v30 = vpop.f32.mrf.mxu0 }
 0x162   : > { %3521 = vmatprep.subr.mxu1 %v2791_v33  ;;  %v3426_v10 = vrot.slane %v1194_v54, 9  ;;  %v1952_v1 = vmax.f32 %v1186_v42, %v3425_v46  ;;  %v710_v16 = vmul.f32 %v4393_v9, %v671_v0  ;;  %v673_v17 = vmax.f32 %v623_v43, 0.0  ;;  %v2788_v42 = vld [vmem:[%s4984_s5 + $0x80] sm:$0xff]  ;;  %v2835_v46 = vld [vmem:[%s4984_s5 + $0x1f8] sm:$0xff] }
 0x163   : > { %3522 = vmatpush3.msra.mxu1 %v2775_v50  ;;  %v3360_v22 = vrot.slane %v4527_v3, 9  ;;  %v4551_v23 = vmax.f32 %v1142_v38, %v3359_v24  ;;  %v1162_v36 = vcombine.high %v746_v5, %v746_v5  ;;  %v1169_v25 = vrot.slane %v746_v5, %v4033_v52 }
 0x164   : > { %3523 = vmatprep.subr.mxu1 %v2790_v6  ;;  %v3428_v26 = vrot.slane %v1195_v61, 9  ;;  %v1954_v20 = vmax.f32 %v1193_v45, %v3427_v58  ;;  %v749_v27 = vadd.f32 %v4370_v60, %v710_v16  ;;  %v709_v31 = vmul.f32 %v4393_v9, %v670_v29 }
 0x165   : > { %3524 = vmatpush3.msra.mxu1 %v2774_v8  ;;  %v1693_v48 = vmax.f32 %v1143_v15, %v3358_v4  ;;  %v1176_v40 = vrot.slane %v1162_v36, %v4033_v52  ;;  %v1177_v18 = vcombine.high %v1169_v25, %v1169_v25  ;;  %v3421_v38 = vrot.slane %v1169_v25, 9  ;;  %v2543_v37 = vld [vmem:[#allocation2 + $0x50] sm:$0xff]  ;;  %v2772_v15 = vld [vmem:[%s4984_s5] sm:$0xff] }
 0x166   : > { %v4563_v35 = vld [vmem:[#allocation2 + $0x51] sm:$0xff]  ;;  %3525 = vmatprep.subr.mxu1 %v2789_v63  ;;  %v1953_v44 = vmax.f32 %v1194_v54, %v3426_v10  ;;  %v2016_v28 = vmax.f32 %v4500_v21, %v1952_v1  ;;  %v1213_v55 = vcombine.high %v749_v27, %v749_v27  ;;  %v712_v49 = vmul.f32 %v4393_v9, %v673_v17 }
 0x167   : > { %v4565_v45 = vld [vmem:[#allocation2 + $0x52] sm:$0xff]  ;;  %2563 = vrot.lane.b32.xlu0 %v2543_v37, %s3820_s20  ;;  %2471 = vst.msk [vmem:[#allocation3 + $0xc8] sm:$0xff] %vm2036_vm2, %v2543_v37  ;;  %2599 = vst.msk [vmem:[#allocation3 + $0xb0] sm:$0xff] %vm2036_vm2, %v4563_v35  ;;  %v1178_v21 = vcombine.high %v1176_v40, %v1176_v40  ;;  %v3422_v56 = vrot.slane %v1177_v18, 9  ;;  %v3423_v57 = vrot.slane %v1176_v40, 9  ;;  %v1948_v54 = vmax.f32 %v1169_v25, %v3421_v38 }
 0x168   : > { %2727 = vst.msk [vmem:[#allocation3 + $0x98] sm:$0xff] %vm2036_vm2, %v4565_v45  ;;  %2536 = vst.msk [vmem:[#allocation3 + $0xd0] sm:$0xff] %vm2036_vm2, %v4565_v45  ;;  %2500 = vrot.lane.b32.xlu1 %v4563_v35, %s3820_s20  ;;  %3526 = vmatpush3.msra.mxu1 %v2773_v34  ;;  %v1955_v39 = vmax.f32 %v1195_v61, %v3428_v26  ;;  %v2018_v62 = vmax.f32 %v4510_v32, %v1954_v20 }
 0x169   : > { %2663 = vst.msk [vmem:[#allocation3 + $0x90] sm:$0xff] %vm2036_vm2, %v2543_v37  ;;  %v1220_v33 = vrot.slane %v749_v27, %v4033_v52  ;;  %v748_v24 = vadd.f32 %v4370_v60, %v709_v31  ;;  %3527 = vmatprep.subr.mxu1 %v2788_v42  ;;  %v3424_v43 = vrot.slane %v1178_v21, 9  ;;  %v1949_v50 = vmax.f32 %v1177_v18, %v3422_v56 }
 0x16a   : > { %v1950_v58 = vmax.f32 %v1176_v40, %v3423_v57  ;;  %v2012_v0 = vmax.f32 %v4540_v59, %v1948_v54  ;;  %3528 = vmatpush3.msra.mxu1 %v2772_v15  ;;  %v1695_v29 = vmax.f32 %v4527_v3, %v3360_v22  ;;  %v2017_v6 = vmax.f32 %v4507_v51, %v1953_v44  ;;  %v3677_v3 = vpop.f32.mrf.mxu0 }
 0x16b   : > { %v2301_v61 = vrot.slane %v2016_v28, %v4055_v19  ;;  %v751_v32 = vadd.f32 %v4370_v60, %v712_v49  ;;  %3553 = vmatprep.subr.mxu1 %v2835_v46  ;;  %v1951_v4 = vmax.f32 %v1178_v21, %v3424_v43  ;;  %v2013_v5 = vmax.f32 %v1693_v48, %v1949_v50 }
 0x16c   : > { %v2014_v8 = vmax.f32 %v4551_v23, %v1950_v58  ;;  %v1227_v10 = vrot.slane %v1213_v55, %v4033_v52  ;;  %v2019_v1 = vmax.f32 %v4538_v47, %v1955_v39  ;;  %v2309_v59 = vrot.slane %v2018_v62, %v4055_v19  ;;  %v627_v37 = vpop.f32.mrf.mxu0 }
 0x16d   : > { %v1228_v16 = vcombine.high %v1220_v33, %v1220_v33  ;;  %v1196_v17 = vcombine.high %v748_v24, %v748_v24  ;;  %v2015_v63 = vmax.f32 %v1695_v29, %v1951_v4  ;;  %v2285_v51 = vrot.slane %v2012_v0, %v4055_v19 }
 0x16e   : > { %v2289_v22 = vrot.slane %v2013_v5, %v4055_v19  ;;  %v2293_v36 = vrot.slane %v2014_v8, %v4055_v19  ;;  %v2305_v26 = vrot.slane %v2017_v6, %v4055_v19  ;;  %v3369_v23 = vrot.slane %v1220_v33, 9 }
 0x16f   : > { %v2751_v25 = vld [vmem:[#allocation3 + $0x98] sm:$0xff]  ;;  %v1203_v20 = vrot.slane %v748_v24, %v4033_v52  ;;  %v618_v47 = vadd.f32 %v4350_v53, %v617_v30  ;;  %v2297_v27 = vrot.slane %v2015_v63, %v4055_v19  ;;  %v1229_v34 = vcombine.high %v1227_v10, %v1227_v10 }
 0x170   : > { %3701 = vmatmul.mubr.msk.f32.gmra.mxu0 %vm2036_vm2, %v2751_v25  ;;  %v2420_v31 = vsel %vm2378_vm4, %v2289_v22, %v2285_v51  ;;  %v1247_v42 = vcombine.high %v751_v32, %v751_v32  ;;  %v2313_v48 = vrot.slane %v2019_v1, %v4055_v19  ;;  %v3370_v18 = vrot.slane %v1228_v16, 9 }
 0x171   : > { %v2421_v40 = vsel %vm2380_vm5, %v2293_v36, %v2420_v31  ;;  %v1210_v38 = vrot.slane %v1196_v17, %v4033_v52  ;;  %v3371_v28 = vrot.slane %v1227_v10, 9  ;;  %v1254_v55 = vrot.slane %v751_v32, %v4033_v52 }
 0x172   : > { %v2422_v44 = vsel %vm2382_vm6, %v2297_v27, %v2421_v40  ;;  %v1261_v49 = vrot.slane %v1247_v42, %v4033_v52  ;;  %v1211_v21 = vcombine.high %v1203_v20, %v1203_v20  ;;  %v672_v56 = vmax.f32 %v618_v47, 0.0 }
 0x173   : > { %v2423_v15 = vsel %vm2384_vm7, %v2301_v61, %v2422_v44  ;;  %v633_v57 = vadd.f32 %v4350_v53, %v3677_v3  ;;  %v3372_v46 = vrot.slane %v1229_v34, 9  ;;  %v4616_v39 = vmax.f32 %v1220_v33, %v3369_v23  ;;  %v3680_v44 = vpop.f32.mrf.mxu0 }
 0x174   : > { %v2424_v54 = vsel %vm2386_vm8, %v2305_v26, %v2423_v15  ;;  %v628_v62 = vadd.f32 %v4350_v53, %v627_v37  ;;  %v1212_v30 = vcombine.high %v1210_v38, %v1210_v38  ;;  %v711_v43 = vmul.f32 %v4393_v9, %v672_v56 }
 0x175   : > { %v2425_v24 = vsel %vm2388_vm9, %v2309_v59, %v2424_v54  ;;  %v675_v50 = vmax.f32 %v633_v57, 0.0  ;;  %v3365_v0 = vrot.slane %v1203_v20, 9  ;;  %v1262_v29 = vcombine.high %v1254_v55, %v1254_v55 }
 0x176   : > { %v2426_v58 = vsel %vm2390_vm10, %v2313_v48, %v2425_v24  ;;  %v1263_v6 = vcombine.high %v1261_v49, %v1261_v49  ;;  %v4623_v61 = vmax.f32 %v1228_v16, %v3370_v18  ;;  %v4625_v32 = vmax.f32 %v1227_v10, %v3371_v28 }
 0x177   : > { %2455 = vst.msk [vmem:[#allocation2 + $0x61] sm:$0xff] %vm2036_vm2, %v2426_v58  ;;  %v3366_v33 = vrot.slane %v1211_v21, 9  ;;  %v750_v4 = vadd.f32 %v4370_v60, %v711_v43  ;;  %v3433_v5 = vrot.slane %v1254_v55, 9  ;;  %v3435_v8 = vrot.slane %v1261_v49, 9 }
 0x178   : > { %v714_v1 = vmul.f32 %v4393_v9, %v675_v50  ;;  %v674_v59 = vmax.f32 %v628_v62, 0.0  ;;  %v4629_v17 = vmax.f32 %v1229_v34, %v3372_v46  ;;  %v3367_v3 = vrot.slane %v1210_v38, 9 }
 0x179   : > { %v1230_v63 = vcombine.high %v750_v4, %v750_v4  ;;  %v1237_v51 = vrot.slane %v750_v4, %v4033_v52  ;;  %v3368_v22 = vrot.slane %v1212_v30, 9  ;;  %v1700_v36 = vmax.f32 %v1203_v20, %v3365_v0 }
 0x17a   : > { %v3434_v16 = vrot.slane %v1262_v29, 9  ;;  %v3436_v25 = vrot.slane %v1263_v6, 9  ;;  %v1701_v10 = vmax.f32 %v1211_v21, %v3366_v33  ;;  %v1960_v27 = vmax.f32 %v1254_v55, %v3433_v5 }
 0x17b   : > { %v1244_v26 = vrot.slane %v1230_v63, %v4033_v52  ;;  %v1245_v23 = vcombine.high %v1237_v51, %v1237_v51  ;;  %v3429_v47 = vrot.slane %v1237_v51, 9  ;;  %v1962_v31 = vmax.f32 %v1261_v49, %v3435_v8 }
 0x17c   : > { %v753_v42 = vadd.f32 %v4370_v60, %v714_v1  ;;  %v713_v34 = vmul.f32 %v4393_v9, %v674_v59  ;;  %v1702_v28 = vmax.f32 %v1210_v38, %v3367_v3  ;;  %v1703_v20 = vmax.f32 %v1212_v30, %v3368_v22  ;;  %v2556_v59 = vpop.permute.xlu0 %2555 }
 0x17d   : > { %v1246_v48 = vcombine.high %v1244_v26, %v1244_v26  ;;  %v3430_v40 = vrot.slane %v1245_v23, 9  ;;  %v3431_v18 = vrot.slane %v1244_v26, 9  ;;  %v1956_v37 = vmax.f32 %v1237_v51, %v3429_v47  ;;  %2579 = vst.msk [vmem:[#allocation3 + $0x8] sm:$0xff] %vm2514_vm11, %v2556_v59 }
 0x17e   : > { %v1961_v15 = vmax.f32 %v1262_v29, %v3434_v16  ;;  %v1963_v56 = vmax.f32 %v1263_v6, %v3436_v25  ;;  %v2544_v21 = vld [vmem:[#allocation2 + $0x60] sm:$0xff]  ;;  %v2024_v38 = vmax.f32 %v4616_v39, %v1960_v27  ;;  %v2026_v24 = vmax.f32 %v4625_v32, %v1962_v31  ;;  %v637_v6 = vpop.f32.mrf.mxu0 }
 0x17f   : > { %v4635_v57 = vld [vmem:[#allocation2 + $0x61] sm:$0xff]  ;;  %v3432_v55 = vrot.slane %v1246_v48, 9  ;;  %v1957_v49 = vmax.f32 %v1245_v23, %v3430_v40  ;;  %v1958_v46 = vmax.f32 %v1244_v26, %v3431_v18  ;;  %v2020_v62 = vmax.f32 %v1700_v36, %v1956_v37  ;;  %2565 = vrot.lane.b32.xlu0 %v2544_v21, %s3820_s20  ;;  %2472 = vst.msk [vmem:[#allocation3 + $0xf0] sm:$0xff] %vm2036_vm2, %v2544_v21 }
 0x180   : > { %v4637_v54 = vld [vmem:[#allocation2 + $0x62] sm:$0xff]  ;;  %2502 = vrot.lane.b32.xlu1 %v4635_v57, %s3820_s20  ;;  %2600 = vst.msk [vmem:[#allocation3 + $0xd8] sm:$0xff] %vm2036_vm2, %v4635_v57  ;;  %2664 = vst.msk [vmem:[#allocation3 + $0xb8] sm:$0xff] %vm2036_vm2, %v2544_v21  ;;  %v752_v30 = vadd.f32 %v4370_v60, %v713_v34  ;;  %v643_v43 = vadd.f32 %v4350_v53, %v3680_v44  ;;  %v1281_v29 = vcombine.high %v753_v42, %v753_v42  ;;  %v2491_v34 = vpop.permute.xlu0 %2490 }
 0x181   : > { %2728 = vst.msk [vmem:[#allocation3 + $0xc0] sm:$0xff] %vm2036_vm2, %v4637_v54  ;;  %2537 = vst.msk [vmem:[#allocation3 + $0xf8] sm:$0xff] %vm2036_vm2, %v4637_v54  ;;  %v1959_v50 = vmax.f32 %v1246_v48, %v3432_v55  ;;  %v2021_v58 = vmax.f32 %v1701_v10, %v1957_v49  ;;  %v2022_v0 = vmax.f32 %v1702_v28, %v1958_v46 }
 0x182   : > { %v2025_v33 = vmax.f32 %v4623_v61, %v1961_v15  ;;  %v2027_v4 = vmax.f32 %v4629_v17, %v1963_v56  ;;  %v1288_v5 = vrot.slane %v753_v42, %v4033_v52  ;;  %v2317_v39 = vrot.slane %v2020_v62, %v4055_v19  ;;  %2515 = vst.msk [vmem:[#allocation3] sm:$0xff] %vm2514_vm11, %v2491_v34 }
 0x183   : > { %v2023_v8 = vmax.f32 %v1703_v20, %v1959_v50  ;;  %v2321_v32 = vrot.slane %v2021_v58, %v4055_v19  ;;  %v2325_v1 = vrot.slane %v2022_v0, %v4055_v19  ;;  %v2333_v3 = vrot.slane %v2024_v38, %v4055_v19 }
 0x184   : > { %v1264_v63 = vcombine.high %v752_v30, %v752_v30  ;;  %v677_v51 = vmax.f32 %v643_v43, 0.0  ;;  %v638_v22 = vadd.f32 %v4350_v53, %v637_v6  ;;  %v2341_v61 = vrot.slane %v2026_v24, %v4055_v19 }
 0x185   : > { %v2329_v17 = vrot.slane %v2023_v8, %v4055_v19  ;;  %v2427_v36 = vsel %vm2378_vm4, %v2321_v32, %v2317_v39  ;;  %v4666_v16 = vrot.slane %v1281_v29, %v4033_v52  ;;  %v2337_v25 = vrot.slane %v2025_v33, %v4055_v19 }
 0x186   : > { %v2428_v10 = vsel %vm2380_vm5, %v2325_v1, %v2427_v36  ;;  %v1271_v26 = vrot.slane %v752_v30, %v4033_v52  ;;  %v716_v23 = vmul.f32 %v4393_v9, %v677_v51  ;;  %v2345_v53 = vrot.slane %v2027_v4, %v4055_v19 }
 0x187   : > { %v2429_v27 = vsel %vm2382_vm6, %v2329_v17, %v2428_v10  ;;  %v4674_v31 = vcombine.high %v1288_v5, %v1288_v5  ;;  %v676_v42 = vmax.f32 %v638_v22, 0.0  ;;  %v3377_v40 = vrot.slane %v1288_v5, 9 }
 0x188   : > { %v2756_v47 = vld [vmem:[#allocation3 + $0xc0] sm:$0xff]  ;;  %v2430_v48 = vsel %vm2384_vm7, %v2333_v3, %v2429_v27  ;;  %v1278_v18 = vrot.slane %v1264_v63, %v4033_v52  ;;  %v755_v37 = vadd.f32 %v4370_v60, %v716_v23  ;;  %v4683_v28 = vcombine.high %v4666_v16, %v4666_v16 }
 0x189   : > { %3703 = vmatprep.mubr.msk.f32.mxu0 %vm2036_vm2, %v2756_v47  ;;  %v2431_v44 = vsel %vm2386_vm8, %v2337_v25, %v2430_v48  ;;  %v715_v20 = vmul.f32 %v4393_v9, %v676_v42  ;;  %v1279_v56 = vcombine.high %v1271_v26, %v1271_v26  ;;  %v3378_v46 = vrot.slane %v4674_v31, 9  ;;  %v2733_v25 = vld [vmem:[#allocation3 + $0x8] sm:$0xff]  ;;  %v2732_v10 = vld [vmem:[#allocation3] sm:$0xff] }
 0x18a   : > { %v2432_v15 = vsel %vm2388_vm9, %v2341_v61, %v2431_v44  ;;  %v1315_v21 = vcombine.high %v755_v37, %v755_v37  ;;  %v1322_v55 = vrot.slane %v755_v37, %v4033_v52  ;;  %v3379_v62 = vrot.slane %v4666_v16, 9  ;;  %2939 = vmatprep.mubr.f32.mxu1 %v2733_v25 }
 0x18b   : > { %v2433_v49 = vsel %vm2390_vm10, %v2345_v53, %v2432_v15  ;;  %v754_v38 = vadd.f32 %v4370_v60, %v715_v20  ;;  %v1280_v9 = vcombine.high %v1278_v18, %v1278_v18  ;;  %v3373_v24 = vrot.slane %v1271_v26, 9  ;;  %2940 = vmatmul.mubr.f32.vlgmr.msra.gmra.mxu1 %v2732_v10  ;;  %v2830_v10 = vld [vmem:[%s4984_s5 + $0x1d0] sm:$0xff] }
 0x18c   : > { %2456 = vst.msk [vmem:[#allocation2 + $0x71] sm:$0xff] %vm2036_vm2, %v2433_v49  ;;  %v1329_v30 = vrot.slane %v1315_v21, %v4033_v52  ;;  %v1330_v43 = vcombine.high %v1322_v55, %v1322_v55  ;;  %v4696_v50 = vmax.f32 %v1288_v5, %v3377_v40  ;;  %v3375_v58 = vrot.slane %v1278_v18, 9  ;;  %v2818_v21 = vld [vmem:[%s4984_s5 + $0x170] sm:$0xff] }
 0x18d   : > { %v1298_v0 = vcombine.high %v754_v38, %v754_v38  ;;  %v1305_v29 = vrot.slane %v754_v38, %v4033_v52  ;;  %v3374_v6 = vrot.slane %v1279_v56, 9  ;;  %v3441_v4 = vrot.slane %v1322_v55, 9 }
 0x18e   : > { %v1331_v33 = vcombine.high %v1329_v30, %v1329_v30  ;;  %v3442_v8 = vrot.slane %v1330_v43, 9  ;;  %v3380_v39 = vrot.slane %v4683_v28, 9  ;;  %v3376_v59 = vrot.slane %v1280_v9, 9 }
 0x18f   : > { %v1312_v60 = vrot.slane %v1298_v0, %v4033_v52  ;;  %v1313_v32 = vcombine.high %v1305_v29, %v1305_v29  ;;  %v3437_v1 = vrot.slane %v1305_v29, 9  ;;  %v1708_v3 = vmax.f32 %v1271_v26, %v3373_v24  ;;  %v2819_v52 = vld [vmem:[%s4984_s5 + $0x178] sm:$0xff]  ;;  %v2834_v26 = vld [vmem:[%s4984_s5 + $0x1f0] sm:$0xff]  ;;  %v2817_v0 = vld [vmem:[%s4984_s5 + $0x168] sm:$0xff] }
 0x190   : > { %v3443_v63 = vrot.slane %v1329_v30, 9  ;;  %v3444_v51 = vrot.slane %v1331_v33, 9  ;;  %v1709_v23 = vmax.f32 %v1279_v56, %v3374_v6  ;;  %v1710_v47 = vmax.f32 %v1278_v18, %v3375_v58  ;;  %3554 = vmatpush3.msra.mxu1 %v2819_v52  ;;  %v2812_v52 = vld [vmem:[%s4984_s5 + $0x140] sm:$0xff] }
 0x191   : > { %v1314_v5 = vcombine.high %v1312_v60, %v1312_v60  ;;  %v3438_v22 = vrot.slane %v1313_v32, 9  ;;  %v3439_v61 = vrot.slane %v1312_v60, 9  ;;  %v1964_v17 = vmax.f32 %v1305_v29, %v3437_v1  ;;  %v2558_v36 = vpop.permute.xlu1 %2557  ;;  %3555 = vmatprep.subr.mxu1 %v2834_v26  ;;  %v2811_v26 = vld [vmem:[%s4984_s5 + $0x138] sm:$0xff] }
 0x192   : > { %v1968_v53 = vmax.f32 %v1322_v55, %v3441_v4  ;;  %v1969_v27 = vmax.f32 %v1330_v43, %v3442_v8  ;;  %2580 = vst.msk [vmem:[#allocation3 + $0x30] sm:$0xff] %vm2514_vm11, %v2558_v36  ;;  %v1713_v20 = vmax.f32 %v4674_v31, %v3378_v46  ;;  %v1711_v15 = vmax.f32 %v1280_v9, %v3376_v59  ;;  %v2833_v9 = vld [vmem:[%s4984_s5 + $0x1e8] sm:$0xff] }
 0x193   : > { %v3440_v42 = vrot.slane %v1314_v5, 9  ;;  %v1965_v34 = vmax.f32 %v1313_v32, %v3438_v22  ;;  %v1966_v48 = vmax.f32 %v1312_v60, %v3439_v61  ;;  %v2028_v40 = vmax.f32 %v1708_v3, %v1964_v17  ;;  %v2545_v37 = vld [vmem:[#allocation2 + $0x70] sm:$0xff]  ;;  %3556 = vmatpush3.msra.mxu1 %v2818_v21  ;;  %v2815_v61 = vld [vmem:[%s4984_s5 + $0x158] sm:$0xff]  ;;  %v2808_v21 = vld [vmem:[%s4984_s5 + $0x120] sm:$0xff] }
 0x194   : > { %v4708_v44 = vld [vmem:[#allocation2 + $0x71] sm:$0xff]  ;;  %v1970_v56 = vmax.f32 %v1329_v30, %v3443_v63  ;;  %2567 = vrot.lane.b32.xlu0 %v2545_v37, %s3820_s20  ;;  %2473 = vst.msk [vmem:[#allocation3 + $0x118] sm:$0xff] %vm2036_vm2, %v2545_v37  ;;  %2665 = vst.msk [vmem:[#allocation3 + $0xe0] sm:$0xff] %vm2036_vm2, %v2545_v37  ;;  %v1971_v31 = vmax.f32 %v1331_v33, %v3444_v51  ;;  %v1714_v24 = vmax.f32 %v4666_v16, %v3379_v62  ;;  %v2832_v16 = vld [vmem:[%s4984_s5 + $0x1e0] sm:$0xff] }
 0x195   : > { %v4710_v18 = vld [vmem:[#allocation2 + $0x72] sm:$0xff]  ;;  %2504 = vrot.lane.b32.xlu1 %v4708_v44, %s3820_s20  ;;  %2601 = vst.msk [vmem:[#allocation3 + $0x100] sm:$0xff] %vm2036_vm2, %v4708_v44  ;;  %v1967_v55 = vmax.f32 %v1314_v5, %v3440_v42  ;;  %v2029_v49 = vmax.f32 %v1709_v23, %v1965_v34  ;;  %v2030_v46 = vmax.f32 %v1710_v47, %v1966_v48  ;;  %v2493_v38 = vpop.permute.xlu1 %2492  ;;  %v2816_v62 = vld [vmem:[%s4984_s5 + $0x160] sm:$0xff] }
 0x196   : > { %2729 = vst.msk [vmem:[#allocation3 + $0xe8] sm:$0xff] %vm2036_vm2, %v4710_v18  ;;  %2538 = vst.msk [vmem:[#allocation3 + $0x120] sm:$0xff] %vm2036_vm2, %v4710_v18  ;;  %v1715_v30 = vmax.f32 %v4683_v28, %v3380_v39  ;;  %v2032_v43 = vmax.f32 %v4696_v50, %v1968_v53  ;;  %v2033_v58 = vmax.f32 %v1713_v20, %v1969_v27  ;;  %3557 = vmatprep.subr.mxu1 %v2833_v9  ;;  %v2813_v53 = vld [vmem:[%s4984_s5 + $0x148] sm:$0xff]  ;;  %v2828_v27 = vld [vmem:[%s4984_s5 + $0x1c0] sm:$0xff] }
 0x197   : > { %2516 = vst.msk [vmem:[#allocation3 + $0x28] sm:$0xff] %vm2514_vm11, %v2493_v38  ;;  %v2031_v29 = vmax.f32 %v1711_v15, %v1967_v55  ;;  %v2349_v6 = vrot.slane %v2028_v40, %v4055_v19  ;;  %v2353_v33 = vrot.slane %v2029_v49, %v4055_v19  ;;  %v2357_v4 = vrot.slane %v2030_v46, %v4055_v19  ;;  %v2826_v42 = vld [vmem:[%s4984_s5 + $0x1b0] sm:$0xff]  ;;  %v2809_v20 = vld [vmem:[%s4984_s5 + $0x128] sm:$0xff]  ;;  %v2820_v9 = vld [vmem:[%s4984_s5 + $0x180] sm:$0xff] }
 0x198   : > { %v2034_v28 = vmax.f32 %v1714_v24, %v1970_v56  ;;  %v2035_v50 = vmax.f32 %v1715_v30, %v1971_v31  ;;  %3558 = vmatpush3.msra.mxu1 %v2817_v0  ;;  %v2365_v1 = vrot.slane %v2032_v43, %v4055_v19  ;;  %v2369_v3 = vrot.slane %v2033_v58, %v4055_v19  ;;  %v2810_v34 = vld [vmem:[%s4984_s5 + $0x130] sm:$0xff]  ;;  %v2823_v31 = vld [vmem:[%s4984_s5 + $0x198] sm:$0xff] }
 0x199   : > { %2619 = vrot.lane.b32.xlu1 %v4142_v41, %s3820_s20  ;;  %v2361_v8 = vrot.slane %v2031_v29, %v4055_v19  ;;  %v2434_v39 = vsel %vm2378_vm4, %v2353_v33, %v2349_v6  ;;  %v2495_v60 = vpop.permute.xlu1 %2494  ;;  %v2738_v32 = vld [vmem:[#allocation3 + $0x30] sm:$0xff]  ;;  %3559 = vmatprep.subr.mxu1 %v2832_v16  ;;  %v2831_v41 = vld [vmem:[%s4984_s5 + $0x1d8] sm:$0xff] }
 0x19a   : > { %v2435_v59 = vsel %vm2380_vm5, %v2357_v4, %v2434_v39  ;;  %2517 = vst.msk [vmem:[#allocation3 + $0x50] sm:$0xff] %vm2514_vm11, %v2495_v60  ;;  %2944 = vmatprep.mubr.f32.mxu1 %v2738_v32  ;;  %3560 = vmatpush3.msra.mxu1 %v2816_v62  ;;  %v2373_v5 = vrot.slane %v2034_v28, %v4055_v19  ;;  %v2806_v38 = vld [vmem:[%s4984_s5 + $0x110] sm:$0xff] }
 0x19b   : > { %v2436_v63 = vsel %vm2382_vm6, %v2361_v8, %v2435_v59  ;;  %v2377_v17 = vrot.slane %v2035_v50, %v4055_v19  ;;  %3561 = vmatprep.subr.mxu1 %v2831_v41  ;;  %v2829_v19 = vld [vmem:[%s4984_s5 + $0x1c8] sm:$0xff]  ;;  %v2659_v24 = vld [vmem:[#allocation2 + $0x90] sm:$0xff] }
 0x19c   : > { %v2437_v22 = vsel %vm2384_vm7, %v2365_v1, %v2436_v63  ;;  %3562 = vmatpush3.msra.mxu1 %v2815_v61  ;;  %2667 = vst.msk [vmem:[#allocation3 + $0x130] sm:$0xff] %vm2036_vm2, %v2659_v24  ;;  %v2723_v30 = vld [vmem:[#allocation2 + $0x92] sm:$0xff] }
 0x19d   : > { %v2761_v51 = vld [vmem:[#allocation3 + $0xe8] sm:$0xff]  ;;  %2621 = vrot.lane.b32.xlu1 %v4203_v13, %s3820_s20  ;;  %v2438_v36 = vsel %vm2386_vm8, %v2369_v3, %v2437_v22  ;;  %v2814_v13 = vld [vmem:[%s4984_s5 + $0x150] sm:$0xff]  ;;  %3563 = vmatprep.subr.mxu1 %v2830_v10  ;;  %2731 = vst.msk [vmem:[#allocation3 + $0x138] sm:$0xff] %vm2036_vm2, %v2723_v30 }
 0x19e   : > { %3704 = vmatmul.mubr.msk.f32.gmra.mxu0 %vm2036_vm2, %v2761_v51  ;;  %v2737_v25 = vld [vmem:[#allocation3 + $0x28] sm:$0xff]  ;;  %v2439_v23 = vsel %vm2388_vm9, %v2373_v5, %v2438_v36  ;;  %3564 = vmatpush3.msra.mxu1 %v2814_v13  ;;  %v2675_v0 = vld [vmem:[#allocation2 + $0x91] sm:$0xff] }
 0x19f   : > { %2945 = vmatmul.mubr.f32.gmra.mxu1 %v2737_v25  ;;  %v2440_v47 = vsel %vm2390_vm10, %v2377_v17, %v2439_v23  ;;  %3565 = vmatprep.subr.mxu1 %v2829_v19 }
 0x1a0   : > { %2457 = vst.msk [vmem:[#allocation2 + $0x81] sm:$0xff] %vm2036_vm2, %v2440_v47  ;;  %3566 = vmatpush3.msra.mxu1 %v2813_v53 }
 0x1a1   : > { %2623 = vrot.lane.b32.xlu1 %v4273_v7, %s3820_s20  ;;  %v2827_v7 = vld [vmem:[%s4984_s5 + $0x1b8] sm:$0xff]  ;;  %3567 = vmatprep.subr.mxu1 %v2828_v27  ;;  %v2742_v49 = vld [vmem:[#allocation3 + $0x50] sm:$0xff] }
 0x1a2   : > { %3568 = vmatpush3.msra.mxu1 %v2812_v52 }
 0x1a3   : > { %3569 = vmatprep.subr.mxu1 %v2827_v7 }
 0x1a4   : > { %3570 = vmatpush3.msra.mxu1 %v2811_v26 }
 0x1a5   : > { %2625 = vrot.lane.b32.xlu1 %v4398_v11, %s3820_s20  ;;  %v2825_v11 = vld [vmem:[%s4984_s5 + $0x1a8] sm:$0xff]  ;;  %3571 = vmatprep.subr.mxu1 %v2826_v42 }
 0x1a6   : > { %3572 = vmatpush3.msra.mxu1 %v2810_v34 }
 0x1a7   : > { %v2546_v48 = vld [vmem:[#allocation2 + $0x80] sm:$0xff]  ;;  %3573 = vmatprep.subr.mxu1 %v2825_v11 }
 0x1a8   : > { %v2722_v40 = vld [vmem:[#allocation2 + $0x82] sm:$0xff]  ;;  %2569 = vrot.lane.b32.xlu0 %v2546_v48, %s3820_s20  ;;  %2666 = vst.msk [vmem:[#allocation3 + $0x108] sm:$0xff] %vm2036_vm2, %v2546_v48  ;;  %3574 = vmatpush3.msra.mxu1 %v2809_v20 }
 0x1a9   : > { %v2674_v37 = vld [vmem:[#allocation2 + $0x81] sm:$0xff]  ;;  %2730 = vst.msk [vmem:[#allocation3 + $0x110] sm:$0xff] %vm2036_vm2, %v2722_v40  ;;  %2627 = vrot.lane.b32.xlu1 %v4565_v45, %s3820_s20 }
 0x1aa   : > { %2602 = vst.msk [vmem:[#allocation3 + $0x128] sm:$0xff] %vm2036_vm2, %v2674_v37  ;;  %v2824_v45 = vld [vmem:[%s4984_s5 + $0x1a0] sm:$0xff] }
 0x1ab   : > { %v2560_v15 = vpop.permute.xlu0 %2559  ;;  %3575 = vmatprep.subr.mxu1 %v2824_v45 }
 0x1ac   : > { %v2497_v56 = vpop.permute.xlu1 %2496  ;;  %2684 = vrot.lane.b32.xlu0 %v4205_v14, %s3820_s20  ;;  %2581 = vst.msk [vmem:[#allocation3 + $0x58] sm:$0xff] %vm2514_vm11, %v2560_v15  ;;  %3576 = vmatpush3.msra.mxu1 %v2808_v21  ;;  %v2807_v14 = vld [vmem:[%s4984_s5 + $0x118] sm:$0xff] }
 0x1ad   : > { %2629 = vrot.lane.b32.xlu1 %v4637_v54, %s3820_s20  ;;  %2518 = vst.msk [vmem:[#allocation3 + $0x78] sm:$0xff] %vm2514_vm11, %v2497_v56  ;;  %v2822_v54 = vld [vmem:[%s4984_s5 + $0x190] sm:$0xff]  ;;  %3577 = vmatprep.subr.mxu1 %v2823_v31 }
 0x1ae   : > { %3578 = vmatpush3.msra.mxu1 %v2807_v14 }
 0x1af   : > { %3579 = vmatprep.subr.mxu1 %v2822_v54 }
 0x1b0   : > { %v2766_v55 = vld [vmem:[#allocation3 + $0x110] sm:$0xff]  ;;  %2686 = vrot.lane.b32.xlu0 %v4271_v2, %s3820_s20  ;;  %v2821_v2 = vld [vmem:[%s4984_s5 + $0x188] sm:$0xff]  ;;  %3580 = vmatpush3.msra.mxu1 %v2806_v38 }
 0x1b1   : > { %3706 = vmatprep.mubr.msk.f32.mxu0 %vm2036_vm2, %v2766_v55  ;;  %2631 = vrot.lane.b32.xlu1 %v4710_v18, %s3820_s20  ;;  %v2805_v18 = vld [vmem:[%s4984_s5 + $0x108] sm:$0xff] }
 0x1b2   : > { %3581 = vmatprep.subr.mxu1 %v2821_v2 }
 0x1b3   : > { %v2743_v46 = vld [vmem:[#allocation3 + $0x58] sm:$0xff]  ;;  %3582 = vmatpush3.msra.mxu1 %v2805_v18 }
 0x1b4   : > { %2688 = vrot.lane.b32.xlu0 %v4396_v12, %s3820_s20  ;;  %2949 = vmatprep.mubr.f32.mxu1 %v2743_v46  ;;  %v2804_v12 = vld [vmem:[%s4984_s5 + $0x100] sm:$0xff]  ;;  %v2747_v29 = vld [vmem:[#allocation3 + $0x78] sm:$0xff] }
 0x1b5   : > { %2633 = vrot.lane.b32.xlu1 %v2722_v40, %s3820_s20  ;;  %2950 = vmatmul.mubr.f32.gmra.mxu1 %v2742_v49 }
 0x1b6   : > { %3583 = vmatprep.subr.mxu1 %v2820_v9 }
 0x1b7   : > { %3584 = vmatpush3.msra.mxu1 %v2804_v12 }
 0x1b8   : > { %2690 = vrot.lane.b32.xlu0 %v4563_v35, %s3820_s20  ;;  %v2771_v35 = vld [vmem:[#allocation3 + $0x138] sm:$0xff] }
 0x1b9   : > { %3707 = vmatmul.mubr.msk.f32.gmra.mxu0 %vm2036_vm2, %v2771_v35 }
 0x1bc   : > { %2692 = vrot.lane.b32.xlu0 %v4635_v57, %s3820_s20 }
 0x1c0   : > { %2694 = vrot.lane.b32.xlu0 %v4708_v44, %s3820_s20 }
 0x1c1   : > { %v2562_v43 = vpop.permute.xlu0 %2561 }
 0x1c2   : > { %v2499_v58 = vpop.permute.xlu1 %2498  ;;  %2582 = vst.msk [vmem:[#allocation3 + $0x80] sm:$0xff] %vm2514_vm11, %v2562_v43 }
 0x1c3   : > { %2519 = vst.msk [vmem:[#allocation3 + $0xa0] sm:$0xff] %vm2514_vm11, %v2499_v58 }
 0x1c4   : > { %2696 = vrot.lane.b32.xlu0 %v2674_v37, %s3820_s20 }
 0x1c8   : > { %2698 = vrot.lane.b32.xlu0 %v2675_v0, %s3820_s20  ;;  %s269_s20 = sand.u32 1, %s3808_s25  }
 0x1c9   : > { %v2748_v57 = vld [vmem:[#allocation3 + $0x80] sm:$0xff]  ;;  %s3278_s13 = sshll.u32 %s269_s20, 6  ;;  %s4939_s21 = scalar_lea.sflag [#allocation5], %s269_s20 }
 0x1ca   : > { %2954 = vmatprep.mubr.f32.mxu1 %v2748_v57  ;;  %v2752_v4 = vld [vmem:[#allocation3 + $0xa0] sm:$0xff]  ;;  %s4911_s14 = scalar_lea.vmem [#allocation4], %s3278_s13 }
 0x1cb   : > { %2955 = vmatmul.mubr.f32.gmra.mxu1 %v2747_v29  ;;  %s3212_s16 = sshll.u32 %s4911_s14, 4  ;;  %s4934_s16 = int_to_ptr.vmem [resolvable:$true] %s3212_s16 }
 0x1cc   : > { %s3756_s22 = scalar_lea.vmem %s4934_s16, 1024  ;;  %p3763_p0 = scmp.lt.s32.totalorder %s4934_s16, %s3761_s23 }
 0x1cd   : > { %p3757_p11 = scmp.ne.s32.totalorder %s4934_s16, %s3756_s22  ;;  %p3764_p1 = scmp.lt.s32.totalorder %s3762_s29, %s3756_s22 }
 0x1cf   : > { %p3758_p12 = pnand %p3757_p11, %p3902_p5  ;;  %p3765_p2 = por %p3764_p1, %p3763_p0 }
 0x1d1   : > { %p3759_p13 = pneg %p3758_p12 }
 0x1d3   : > { %p3766_p3 = pnand %p3765_p2, %p3759_p13 }
 0x1d9   : > { %v2564_v6 = vpop.permute.xlu0 %2563 }
 0x1da   : > { %2583 = vst.msk [vmem:[#allocation3 + $0xa8] sm:$0xff] %vm2514_vm11, %v2564_v6  ;;  %v2501_v44 = vpop.permute.xlu1 %2500 }
 0x1db   : > { %2520 = vst.msk [vmem:[#allocation3 + $0xc8] sm:$0xff] %vm2514_vm11, %v2501_v44 }
 0x1e1   : > { %v2753_v33 = vld [vmem:[#allocation3 + $0xa8] sm:$0xff] }
 0x1e2   : > { %2959 = vmatprep.mubr.f32.mxu1 %v2753_v33  ;;  %v2757_v50 = vld [vmem:[#allocation3 + $0xc8] sm:$0xff]  ;;  %v4905_v33 = vld [vmem:[%s4985_s6] ss:$0 sm:$0xff] }
 0x1e3   : > { %2960 = vmatmul.mubr.f32.gmra.mxu1 %v2752_v4 }
 0x1f1   : > { %v2566_v16 = vpop.permute.xlu0 %2565 }
 0x1f2   : > { %v2503_v28 = vpop.permute.xlu1 %2502  ;;  %2584 = vst.msk [vmem:[#allocation3 + $0xd0] sm:$0xff] %vm2514_vm11, %v2566_v16 }
 0x1f3   : > { %2521 = vst.msk [vmem:[#allocation3 + $0xf0] sm:$0xff] %vm2514_vm11, %v2503_v28 }
 0x1f9   : > { %v2758_v62 = vld [vmem:[#allocation3 + $0xd0] sm:$0xff] }
 0x1fa   : > { %2964 = vmatprep.mubr.f32.mxu1 %v2758_v62  ;;  %v2762_v59 = vld [vmem:[#allocation3 + $0xf0] sm:$0xff] }
 0x1fb   : > { %2965 = vmatmul.mubr.f32.gmra.mxu1 %v2757_v50 }
 0x203   : > { %v3699_v44 = vpop.f32.mrf.mxu0 }
 0x206   : > { %v2568_v8 = vpop.permute.xlu0 %2567 }
 0x207   : > { %v2505_v39 = vpop.permute.xlu1 %2504  ;;  %2585 = vst.msk [vmem:[#allocation3 + $0xf8] sm:$0xff] %vm2514_vm11, %v2568_v8 }
 0x208   : > { %2522 = vst.msk [vmem:[#allocation3 + $0x118] sm:$0xff] %vm2514_vm11, %v2505_v39  ;;  %v3151_v39 = vpop.f32.mrf.mxu0 }
 0x20b   : > { %v2620_v60 = vpop.permute.xlu1 %2619 }
 0x20c   : > { %2643 = vst.msk [vmem:[#allocation3 + $0x10] sm:$0xff] %vm2514_vm11, %v2620_v60 }
 0x20e   : > { %v2763_v1 = vld [vmem:[#allocation3 + $0xf8] sm:$0xff] }
 0x20f   : > { %v2622_v32 = vpop.permute.xlu1 %2621  ;;  %2969 = vmatprep.mubr.f32.mxu1 %v2763_v1  ;;  %v2767_v36 = vld [vmem:[#allocation3 + $0x118] sm:$0xff] }
 0x210   : > { %2644 = vst.msk [vmem:[#allocation3 + $0x38] sm:$0xff] %vm2514_vm11, %v2622_v32  ;;  %2970 = vmatmul.mubr.f32.gmra.mxu1 %v2762_v59 }
 0x213   : > { %v2624_v41 = vpop.permute.xlu1 %2623  ;;  %v2734_v13 = vld [vmem:[#allocation3 + $0x10] sm:$0xff] }
 0x214   : > { %2645 = vst.msk [vmem:[#allocation3 + $0x60] sm:$0xff] %vm2514_vm11, %v2624_v41 }
 0x217   : > { %v2626_v3 = vpop.permute.xlu1 %2625  ;;  %v2739_v27 = vld [vmem:[#allocation3 + $0x38] sm:$0xff] }
 0x218   : > { %2646 = vst.msk [vmem:[#allocation3 + $0x88] sm:$0xff] %vm2514_vm11, %v2626_v3 }
 0x21a   : > { %v2570_v63 = vpop.permute.xlu0 %2569 }
 0x21b   : > { %v2628_v51 = vpop.permute.xlu1 %2627  ;;  %2586 = vst.msk [vmem:[#allocation3 + $0x120] sm:$0xff] %vm2514_vm11, %v2570_v63  ;;  %v2744_v26 = vld [vmem:[#allocation3 + $0x60] sm:$0xff] }
 0x21c   : > { %2647 = vst.msk [vmem:[#allocation3 + $0xb0] sm:$0xff] %vm2514_vm11, %v2628_v51 }
 0x21e   : > { %v2685_v5 = vpop.permute.xlu0 %2684 }
 0x21f   : > { %v2630_v22 = vpop.permute.xlu1 %2629  ;;  %2708 = vst.msk [vmem:[#allocation3 + $0x18] sm:$0xff] %vm2514_vm11, %v2685_v5  ;;  %v2749_v48 = vld [vmem:[#allocation3 + $0x88] sm:$0xff] }
 0x220   : > { %2648 = vst.msk [vmem:[#allocation3 + $0xd8] sm:$0xff] %vm2514_vm11, %v2630_v22 }
 0x222   : > { %v2687_v61 = vpop.permute.xlu0 %2686  ;;  %v2768_v17 = vld [vmem:[#allocation3 + $0x120] sm:$0xff] }
 0x223   : > { %2709 = vst.msk [vmem:[#allocation3 + $0x40] sm:$0xff] %vm2514_vm11, %v2687_v61  ;;  %2974 = vmatprep.mubr.f32.mxu1 %v2768_v17  ;;  %v2632_v25 = vpop.permute.xlu1 %2631  ;;  %v2754_v11 = vld [vmem:[#allocation3 + $0xb0] sm:$0xff] }
 0x224   : > { %2975 = vmatmul.mubr.f32.gmra.mxu1 %v2767_v36  ;;  %2649 = vst.msk [vmem:[#allocation3 + $0x100] sm:$0xff] %vm2514_vm11, %v2632_v25 }
 0x226   : > { %v2689_v10 = vpop.permute.xlu0 %2688  ;;  %v2735_v23 = vld [vmem:[#allocation3 + $0x18] sm:$0xff] }
 0x227   : > { %2710 = vst.msk [vmem:[#allocation3 + $0x68] sm:$0xff] %vm2514_vm11, %v2689_v10  ;;  %3044 = vmatprep.mubr.f32.mxu1 %v2735_v23  ;;  %v2634_v47 = vpop.permute.xlu1 %2633  ;;  %v2759_v56 = vld [vmem:[#allocation3 + $0xd8] sm:$0xff] }
 0x228   : > { %3045 = vmatmul.mubr.f32.vlgmr.msra.gmra.mxu1 %v2734_v13  ;;  %2650 = vst.msk [vmem:[#allocation3 + $0x128] sm:$0xff] %vm2514_vm11, %v2634_v47 }
 0x22a   : > { %v2691_v19 = vpop.permute.xlu0 %2690  ;;  %v2740_v53 = vld [vmem:[#allocation3 + $0x40] sm:$0xff] }
 0x22b   : > { %2711 = vst.msk [vmem:[#allocation3 + $0x90] sm:$0xff] %vm2514_vm11, %v2691_v19  ;;  %3049 = vmatprep.mubr.f32.mxu1 %v2740_v53  ;;  %v2764_v21 = vld [vmem:[#allocation3 + $0x100] sm:$0xff] }
 0x22c   : > { %3050 = vmatmul.mubr.f32.gmra.mxu1 %v2739_v27 }
 0x22e   : > { %v2693_v52 = vpop.permute.xlu0 %2692  ;;  %v2745_v7 = vld [vmem:[#allocation3 + $0x68] sm:$0xff] }
 0x22f   : > { %2712 = vst.msk [vmem:[#allocation3 + $0xb8] sm:$0xff] %vm2514_vm11, %v2693_v52  ;;  %3054 = vmatprep.mubr.f32.mxu1 %v2745_v7  ;;  %v2769_v55 = vld [vmem:[#allocation3 + $0x128] sm:$0xff] }
 0x230   : > { %3055 = vmatmul.mubr.f32.gmra.mxu1 %v2744_v26  ;;  %v3702_v51 = vpop.f32.mrf.mxu0 }
 0x232   : > { %v2695_v42 = vpop.permute.xlu0 %2694  ;;  %v2750_v34 = vld [vmem:[#allocation3 + $0x90] sm:$0xff]  ;;  %v3161_v23 = vpop.f32.mrf.mxu0 }
 0x233   : > { %2713 = vst.msk [vmem:[#allocation3 + $0xe0] sm:$0xff] %vm2514_vm11, %v2695_v42  ;;  %3059 = vmatprep.mubr.f32.mxu1 %v2750_v34 }
 0x234   : > { %3060 = vmatmul.mubr.f32.gmra.mxu1 %v2749_v48 }
 0x236   : > { %v2697_v40 = vpop.permute.xlu0 %2696  ;;  %v2755_v37 = vld [vmem:[#allocation3 + $0xb8] sm:$0xff] }
 0x237   : > { %2714 = vst.msk [vmem:[#allocation3 + $0x108] sm:$0xff] %vm2514_vm11, %v2697_v40  ;;  %3064 = vmatprep.mubr.f32.mxu1 %v2755_v37 }
 0x238   : > { %3065 = vmatmul.mubr.f32.gmra.mxu1 %v2754_v11 }
 0x23a   : > { %v2699_v20 = vpop.permute.xlu0 %2698  ;;  %v2760_v15 = vld [vmem:[#allocation3 + $0xe0] sm:$0xff] }
 0x23b   : > { %2715 = vst.msk [vmem:[#allocation3 + $0x130] sm:$0xff] %vm2514_vm11, %v2699_v20  ;;  %3069 = vmatprep.mubr.f32.mxu1 %v2760_v15 }
 0x23c   : > { %3070 = vmatmul.mubr.f32.gmra.mxu1 %v2759_v56 }
 0x23e   : > { %v2765_v45 = vld [vmem:[#allocation3 + $0x108] sm:$0xff] }
 0x23f   : > { %3074 = vmatprep.mubr.f32.mxu1 %v2765_v45 }
 0x240   : > { %3075 = vmatmul.mubr.f32.gmra.mxu1 %v2764_v21 }
 0x242   : > { %v2770_v31 = vld [vmem:[#allocation3 + $0x130] sm:$0xff] }
 0x243   : > { %3079 = vmatprep.mubr.f32.mxu1 %v2770_v31 }
 0x244   : > { %3080 = vmatmul.mubr.f32.gmra.mxu1 %v2769_v55 }
 0x24b   : > { %v3529_v14 = vpop.f32.mrf.mxu1 }
 0x24d   : > { %v3530_v54 = vpop.f32.mrf.mxu1 }
 0x24e   : > { %v3531_v29 = vadd.f32 %v3530_v54, %v3529_v14 }
 0x250   : > { %v2942_v16 = vadd.f32 %v3531_v29, %v4905_v33 }
 0x25e   : > { %v3705_v26 = vpop.f32.mrf.mxu0 }
 0x25f   : > { %v3532_v49 = vpop.f32.mrf.mxu1 }
 0x260   : > { %v3171_v15 = vpop.f32.mrf.mxu0 }
 0x261   : > { %v3533_v46 = vpop.f32.mrf.mxu1 }
 0x262   : > { %v3534_v28 = vadd.f32 %v3533_v46, %v3532_v49 }
 0x264   : > { %v2947_v32 = vadd.f32 %v3534_v28, %v4905_v33 }
 0x275   : > { %v3535_v38 = vpop.f32.mrf.mxu1 }
 0x277   : > { %v3536_v2 = vpop.f32.mrf.mxu1 }
 0x278   : > { %v3537_v1 = vadd.f32 %v3536_v2, %v3535_v38 }
 0x279   : > { %v3708_v54 = vpop.f32.mrf.mxu0 }
 0x27a   : > { %v2952_v22 = vadd.f32 %v3537_v1, %v4905_v33 }
 0x28b   : > { %v3538_v18 = vpop.f32.mrf.mxu1 }
 0x28d   : > { %v3539_v9 = vpop.f32.mrf.mxu1 }
 0x28e   : > { %v3540_v61 = vadd.f32 %v3539_v9, %v3538_v18 }
 0x290   : > { %v2957_v47 = vadd.f32 %v3540_v61, %v4905_v33 }
 0x2a3   : > { %v3541_v12 = vpop.f32.mrf.mxu1 }
 0x2a5   : > { %v3542_v24 = vpop.f32.mrf.mxu1 }
 0x2a6   : > { %v3543_v19 = vadd.f32 %v3542_v24, %v3541_v12  ;;  %v3181_v24 = vpop.f32.mrf.mxu0 }
 0x2a8   : > { %v2962_v34 = vadd.f32 %v3543_v19, %v4905_v33 }
 0x2bb   : > { %v3544_v30 = vpop.f32.mrf.mxu1 }
 0x2bd   : > { %v3545_v43 = vpop.f32.mrf.mxu1 }
 0x2be   : > { %v3546_v48 = vadd.f32 %v3545_v43, %v3544_v30 }
 0x2c0   : > { %v2967_v45 = vadd.f32 %v3546_v48, %v4905_v33 }
 0x2d0   : > { %v3547_v58 = vpop.f32.mrf.mxu1 }
 0x2d2   : > { %v3548_v35 = vpop.f32.mrf.mxu1 }
 0x2d3   : > { %v3549_v21 = vadd.f32 %v3548_v35, %v3547_v58 }
 0x2d5   : > { %v2972_v38 = vadd.f32 %v3549_v21, %v4905_v33 }
 0x2e4   : > { %v4899_v0 = vpop.f32.mrf.mxu1 }
 0x2e6   : > { %v3551_v57 = vpop.f32.mrf.mxu1 }
 0x2e7   : > { %v3552_v2 = vadd.f32 %v3551_v57, %v4899_v0 }
 0x2e8   : > { %v3585_v6 = vpop.f32.mrf.mxu1 }
 0x2e9   : > { %v2977_v58 = vadd.f32 %v3552_v2, %v4905_v33 }
 0x2ea   : > { %v3586_v4 = vpop.f32.mrf.mxu1 }
 0x2eb   : > { %v3587_v62 = vadd.f32 %v3586_v4, %v3585_v6 }
 0x2ec   : > { %v3588_v50 = vpop.f32.mrf.mxu1 }
 0x2ed   : > { %v3047_v8 = vadd.f32 %v3587_v62, %v2942_v16 }
 0x2ee   : > { %v3589_v60 = vpop.f32.mrf.mxu1 }
 0x2ef   : > { %v3152_v59 = vadd.f32 %v3151_v39, %v3047_v8  ;;  %v3590_v41 = vadd.f32 %v3589_v60, %v3588_v50 }
 0x2f0   : > { %v3591_v3 = vpop.f32.mrf.mxu1 }
 0x2f1   : > { %3190 = vst [vmem:[%s4911_s14] sm:$0xff] %v3152_v59  ;;  %v3052_v63 = vadd.f32 %v3590_v41, %v2947_v32 }
 0x2f2   : > { %v3592_v5 = vpop.f32.mrf.mxu1 }
 0x2f3   : > { %v3157_v17 = vadd.f32 %v3699_v44, %v3052_v63  ;;  %v3593_v36 = vadd.f32 %v3592_v5, %v3591_v3 }
 0x2f4   : > { %v3594_v25 = vpop.f32.mrf.mxu1 }
 0x2f5   : > { %3191 = vst [vmem:[%s4911_s14 + $0x8] sm:$0xff] %v3157_v17  ;;  %v3057_v10 = vadd.f32 %v3593_v36, %v2952_v22 }
 0x2f6   : > { %v3595_v13 = vpop.f32.mrf.mxu1 }
 0x2f7   : > { %v3162_v53 = vadd.f32 %v3161_v23, %v3057_v10  ;;  %v3596_v27 = vadd.f32 %v3595_v13, %v3594_v25 }
 0x2f8   : > { %v3597_v52 = vpop.f32.mrf.mxu1 }
 0x2f9   : > { %3192 = vst [vmem:[%s4911_s14 + $0x10] sm:$0xff] %v3162_v53  ;;  %v3062_v7 = vadd.f32 %v3596_v27, %v2957_v47 }
 0x2fa   : > { %v3598_v42 = vpop.f32.mrf.mxu1 }
 0x2fb   : > { %v3167_v40 = vadd.f32 %v3702_v51, %v3062_v7  ;;  %v3599_v37 = vadd.f32 %v3598_v42, %v3597_v52 }
 0x2fc   : > { %v3600_v11 = vpop.f32.mrf.mxu1 }
 0x2fd   : > { %3193 = vst [vmem:[%s4911_s14 + $0x18] sm:$0xff] %v3167_v40  ;;  %v3067_v20 = vadd.f32 %v3599_v37, %v2962_v34 }
 0x2fe   : > { %v3601_v56 = vpop.f32.mrf.mxu1 }
 0x2ff   : > { %v3172_v31 = vadd.f32 %v3171_v15, %v3067_v20  ;;  %v3602_v55 = vadd.f32 %v3601_v56, %v3600_v11 }
 0x300   : > { %v3603_v14 = vpop.f32.mrf.mxu1 }
 0x301   : > { %3194 = vst [vmem:[%s4911_s14 + $0x20] sm:$0xff] %v3172_v31  ;;  %v3072_v49 = vadd.f32 %v3602_v55, %v2967_v45 }
 0x302   : > { %v3604_v46 = vpop.f32.mrf.mxu1 }
 0x303   : > { %v3177_v18 = vadd.f32 %v3705_v26, %v3072_v49  ;;  %v3605_v9 = vadd.f32 %v3604_v46, %v3603_v14 }
 0x304   : > { %v3606_v12 = vpop.f32.mrf.mxu1 }
 0x305   : > { %3195 = vst [vmem:[%s4911_s14 + $0x28] sm:$0xff] %v3177_v18  ;;  %v3077_v30 = vadd.f32 %v3605_v9, %v2972_v38 }
 0x306   : > { %v3607_v43 = vpop.f32.mrf.mxu1 }
 0x307   : > { %v3608_v35 = vadd.f32 %v3607_v43, %v3606_v12  ;;  %v3182_v29 = vadd.f32 %v3181_v24, %v3077_v30 }
 0x309   : > { %v3082_v6 = vadd.f32 %v3608_v35, %v2977_v58  ;;  %3196 = vst [vmem:[%s4911_s14 + $0x30] sm:$0xff] %v3182_v29 }
 0x30b   : > { %v3187_v0 = vadd.f32 %v3708_v54, %v3082_v6 }
 0x30d   : > { %3197 = vst [vmem:[%s4911_s14 + $0x38] sm:$0xff] %v3187_v0 }
 0x30e   : > { %3769 = shalt.err (!%p3766_p3)
}
 0x30f   : > { %s3770_s20 = scalar_lea.hbm %s4932_s19, 1024  ;;  %s3774_s13 = scalar_lea.hbm %s4986_s7, 2048 }
 0x310   : > { %p3771_p4 = scmp.ne.s32.totalorder %s4932_s19, %s3770_s20  ;;  %p3775_p9 = scmp.lt.s32.totalorder %s4932_s19, %s4986_s7 }
 0x311   : > { %p3776_p10 = scmp.lt.s32.totalorder %s3774_s13, %s3770_s20 }
 0x312   : > { %p3772_p7 = pnand %p3771_p4, %p3902_p5 }
 0x313   : > { %p3777_p11 = por %p3776_p10, %p3775_p9 }
 0x314   : > { %p3773_p8 = pneg %p3772_p7 }
 0x316   : > { %p3778_p12 = pnand %p3777_p11, %p3773_p8 }
 0x318   : > { %3781 = shalt.err (!%p3778_p12)
}
 0x319   : > { %s3822_s17 = smov 128   ;;  %s3823_s18 = smov 8  }
 0x31a   : > { %3709 = dma.vmem_to_hbm [thread:$0]  (%p3902_p5), %s4934_s16, 1024, %s4932_s19, %s4939_s21, %s3822_s17, %s3822_s17, %s3823_s18  }
 0x31b PF: > { %p3715_p13 = scmp.ge.s32.totalorder %s3816_s27, 2  ;;  %s3227_s22 = sand.u32 1, %s3804_s24  }
 0x31c   : > { %s3228_s28 = scalar_lea.sflag [#allocation5], %s3227_s22 }
 0x31d   : > { %p3712_p0 = pnand %p3715_p13, %p3906_p6 }
 0x31f   : > { %p3713_p1 = pneg %p3712_p0 }
 0x321   : > { %3799 = dma.done.wait (%p3713_p1), %s3228_s28, 1024  }
 0x322   : > { %3801 = vsyncadd (%p3713_p1), %s3228_s28, 4294966272  ;;  %p17_p2 = scmp.ge.s32.totalorder %s3889_s30, 4   ;;  %s4989_s24 = smov %s3808_s25 }
 0x323   : > { %s4990_s25 = smov %s3812_s26  ;;  %s4991_s26 = smov %s3900_s10 }
 0x324   : > { %s4992_s27 = smov %s3889_s30  ;;  %19 = sbr.rel (!%p17_p2) target bundleno = 3 (0x3), region = 85 }
 0x329   :  { %3233 = vsyncpa [#allocation5], 1 }
 0x32a   :  { %3235 = vsyncpa [#allocation5 + $0x1], 1 }

</bundles_post_ra>
